<compile_context>
chip_gen: v6e
topology: v6e:2x2x1
jax: 0.10.0
libtpu: 0.0.40
codegen_flags: <defaults>
</compile_context>

<pallas_src>
import math
import numpy as np
import jax
import jax.numpy as jnp
from jax import lax
from jax.experimental import pallas as pl
from jax.experimental.pallas import tpu as pltpu

VMEM_SPEC = pl.BlockSpec(memory_space=pltpu.MemorySpace.VMEM)
SMEM_SPEC = pl.BlockSpec(memory_space=pltpu.MemorySpace.SMEM)


# ----------------------------------------------------------------------------
# Fused kernel: bidirectional LSTM + 'last' sentence-embedding gather + (h_n,c_n)
# ----------------------------------------------------------------------------
def _bilstm_encoder_kernel(x_ref, wih_ref, wbd_ref, b_ref, idx_ref,
                           out_ref, sent_ref, hn_ref, cn_ref, gates_sc):
    """
    x_ref:    (T, F)       input tokens (batch of 1, squeezed)
    wih_ref:  (F, 8U)      input weights, gate-major combined columns
                           [i_f i_b | f_f f_b | g_f g_b | o_f o_b]
    wbd_ref:  (2U, 8U)     bf16 blockdiag(whh_f, whh_b), same column order
    b_ref:    (1, 8U)      combined bias (b_ih + b_hh), same column order
    idx_ref:  (S,) int32   SMEM: token index of each sentence embedding
    out_ref:  (T, 2U)      word_level_output  [fwd | bwd]  (PyTorch layout)
    sent_ref: (S, 2U)      sentence_level_output ('last')
    hn_ref:   (2, U)       final hidden (row 0 = fwd @ t=T-1, row 1 = bwd @ t=0)
    cn_ref:   (2, U)       final cell
    gates_sc: (T, 8U)      hoisted input-gate scratch
    """
    T = x_ref.shape[0]
    U = wbd_ref.shape[0] // 2
    S = sent_ref.shape[0]

    # (1) Hoisted input projection: one (T,F)x(F,8U) MXU matmul for all T steps
    #     and both directions (off the recurrence critical path).  Default MXU
    #     precision is acceptable here -- the self-test tolerance accounts for it.
    gates_sc[...] = jnp.dot(x_ref[...], wih_ref[...],
                            preferred_element_type=jnp.float32) + b_ref[...]

    # Lane masks, built once (comparisons only; hoisted out of the loop).
    lane = lax.broadcasted_iota(jnp.int32, (1, 8 * U), 1)

    def _rng(lo, hi):
        return (lane >= lo) & (lane < hi)

    # forward-direction lanes of each gate quarter
    is_fwd = (_rng(0, U) | _rng(2 * U, 3 * U)
              | _rng(4 * U, 5 * U) | _rng(6 * U, 7 * U))
    # candidate-gate (tanh) lanes
    is_g = _rng(4 * U, 6 * U)

    w_bd = wbd_ref[...]                       # (2U, 8U) bf16, hoisted load

    h0 = jnp.zeros((1, 2 * U), jnp.float32)   # [h_f | h_b]
    c0 = jnp.zeros((1, 2 * U), jnp.float32)   # [c_f | c_b]

    # (2) Forward (time t) and backward (time T-1-t) cells fused into a single
    #     lane-dense recurrence: one bf16 MXU matmul + one 128-lane tanh per step.
    def body(t, carry):
        h_c, c_c = carry
        tb = T - 1 - t
        row_f = gates_sc[pl.ds(t, 1), :]            # full-lane row load
        row_b = gates_sc[pl.ds(tb, 1), :]
        g_x = jnp.where(is_fwd, row_f, row_b)       # fwd lanes from t, bwd from tb

        pre = g_x + jnp.dot(h_c.astype(jnp.bfloat16), w_bd,
                            preferred_element_type=jnp.float32)

        # sigmoid(x) = 0.5*(tanh(0.5*x)+1) on i/f/o lanes, tanh(x) on g lanes:
        # exactly ONE 128-lane EUP push for all gate nonlinearities.
        arg = jnp.where(is_g, pre, 0.5 * pre)
        t_all = jnp.tanh(arg)
        act = jnp.where(is_g, t_all, 0.5 * t_all + 0.5)

        i_c = act[:, 0:2 * U]
        f_c = act[:, 2 * U:4 * U]
        g_c = act[:, 4 * U:6 * U]
        o_c = act[:, 6 * U:8 * U]

        c_new = f_c * c_c + i_c * g_c               # combined [fwd | bwd]
        h_new = o_c * jnp.tanh(c_new)

        # (3) store directly into the final output layout -- no extra scratch,
        #     no post-loop lane concatenate.
        out_ref[pl.ds(t, 1), 0:U] = h_new[:, 0:U]
        out_ref[pl.ds(tb, 1), U:2 * U] = h_new[:, U:2 * U]
        return (h_new, c_new)

    h_fin, c_fin = lax.fori_loop(0, T, body, (h0, c0),
                                 unroll=(True if T <= 32 else 8))

    # final (h_n, c_n) in PyTorch layout: direction 0 = forward, 1 = reverse.
    hn_ref[0:1, :] = h_fin[:, 0:U]
    hn_ref[1:2, :] = h_fin[:, U:2 * U]
    cn_ref[0:1, :] = c_fin[:, 0:U]
    cn_ref[1:2, :] = c_fin[:, U:2 * U]

    # (4) Fused 'last' sentence-embedding gather (indices in SMEM, clamped to
    #     avoid silent OOB VMEM reads); word_level_output stays VMEM-resident.
    def gather_body(s, carry):
        i = jnp.clip(idx_ref[s], 0, T - 1)
        sent_ref[pl.ds(s, 1), :] = out_ref[pl.ds(i, 1), :]
        return carry

    lax.fori_loop(0, S, gather_body, 0, unroll=(True if S <= 16 else 4))


def _lstm_encoder_call(x, wih, w_bd, bias, gather_idx):
    T = x.shape[0]
    U = w_bd.shape[0] // 2
    S = gather_idx.shape[0]
    return pl.pallas_call(
        _bilstm_encoder_kernel,
        out_shape=(jax.ShapeDtypeStruct((T, 2 * U), jnp.float32),   # word_level_output
                   jax.ShapeDtypeStruct((S, 2 * U), jnp.float32),   # sentence_level_output
                   jax.ShapeDtypeStruct((2, U), jnp.float32),       # h_n
                   jax.ShapeDtypeStruct((2, U), jnp.float32)),      # c_n
        in_specs=[VMEM_SPEC, VMEM_SPEC, VMEM_SPEC, VMEM_SPEC, SMEM_SPEC],
        out_specs=(VMEM_SPEC, VMEM_SPEC, VMEM_SPEC, VMEM_SPEC),
        scratch_shapes=[
            pltpu.VMEM((T, 8 * U), jnp.float32),   # hoisted input gates (both dirs)
        ],
    )(x, wih, w_bd, bias, gather_idx)


# ----------------------------------------------------------------------------
# Parameters (mirrors nn.LSTM init; weights stored transposed & gate-major
# combined; b_ih+b_hh summed, functionally identical in the forward pass)
# ----------------------------------------------------------------------------
def _gate_major(wf, wb, U):
    """Interleave per-direction gate blocks: [i_f i_b | f_f f_b | g_f g_b | o_f o_b]."""
    parts = []
    for g in range(4):
        parts.append(wf[..., g * U:(g + 1) * U])
        parts.append(wb[..., g * U:(g + 1) * U])
    return jnp.concatenate(parts, axis=-1)


def init_params(key, input_size, hidden_size=0, bidirectional=True):
    if hidden_size <= 0:
        hidden_size = input_size
    if hidden_size % 2 != 0 and bidirectional:
        hidden_size -= 1
    U = hidden_size // 2 if bidirectional else hidden_size
    k = 1.0 / math.sqrt(U)
    ks = jax.random.split(key, 8)

    def u(kk, shape):
        return jax.random.uniform(kk, shape, jnp.float32, -k, k)

    wih_f, whh_f = u(ks[0], (input_size, 4 * U)), u(ks[1], (U, 4 * U))
    bih_f, bhh_f = u(ks[2], (1, 4 * U)), u(ks[3], (1, 4 * U))
    wih_b, whh_b = u(ks[4], (input_size, 4 * U)), u(ks[5], (U, 4 * U))
    bih_b, bhh_b = u(ks[6], (1, 4 * U)), u(ks[7], (1, 4 * U))

    zeros_u = jnp.zeros((U, 4 * U), jnp.float32)
    w_bd = jnp.concatenate(
        [_gate_major(whh_f, zeros_u, U),      # rows for h_f
         _gate_major(zeros_u, whh_b, U)],     # rows for h_b
        axis=0).astype(jnp.bfloat16)          # (2U, 8U) bf16 -> single-pass MXU

    return {
        "hidden_size": hidden_size,
        "unit": U,
        "wih": _gate_major(wih_f, wih_b, U),                       # (F, 8U)
        "bias": _gate_major(bih_f + bhh_f, bih_b + bhh_b, U),      # (1, 8U)
        "w_bd": w_bd,                                              # (2U, 8U) bf16
        # raw per-direction f32 copies, only used by the host reference check
        "ref": {"wih_f": wih_f, "wih_b": wih_b,
                "whh_f": whh_f, "whh_b": whh_b,
                "b_f": bih_f + bhh_f, "b_b": bih_b + bhh_b},
    }


# ----------------------------------------------------------------------------
# Module forward (batch_size=1, dropout=0, sentence_embedding_type='last')
# ----------------------------------------------------------------------------
def forward(params, x_bTD, eos_position_list, connective_position_list=None):
    # TODO(synk): sentence_embedding_type in {'sum','mean','max','self-attentive'},
    # dropout > 0 and sentence_zero_inithidden=True are not implemented (module
    # defaults are used).
    assert x_bTD.shape[0] == 1, "Don't support larger batch size now!"
    x = x_bTD[0]                                           # (T, F)
    T = x.shape[0]

    idxs = []
    for i, eos in enumerate(eos_position_list):
        cp = -1 if connective_position_list is None else connective_position_list[i]
        idx = int(cp) if cp != -1 else int(eos) - 1        # 'last' embedding
        idxs.append(min(max(idx, 0), T - 1))               # host-side bounds clamp
    gather_idx = jnp.asarray(idxs, dtype=jnp.int32)

    word_out, sent_out, hn, cn = _lstm_encoder_call(
        x, params["wih"], params["w_bd"], params["bias"], gather_idx)

    word_level_output = word_out[None]                     # (1, T, hidden)
    sentence_level_output = sent_out[None]                 # (1, S, hidden)
    word_hidden = (hn[:, None, :], cn[:, None, :])         # each (2, 1, U)
    # PyTorch module returns the same hidden tuple twice (word & sentence).
    return word_level_output, sentence_level_output, word_hidden, word_hidden


# ----------------------------------------------------------------------------
# Host float64 reference of the same math (sanity check only)
# ----------------------------------------------------------------------------
def _round_bf16(a):
    """Round-to-nearest-even bf16 quantization in numpy, upcast to float64."""
    x = np.array(a, np.float32)
    u = x.view(np.uint32).astype(np.uint64)
    r = ((u + 0x7FFF + ((u >> 16) & 1)) & 0xFFFF0000).astype(np.uint32)
    return r.view(np.float32).astype(np.float64)


def _reference_forward(ref_p, x, gather_idx):
    x = np.asarray(x, np.float64)
    wih_f = np.asarray(ref_p["wih_f"], np.float64)
    wih_b = np.asarray(ref_p["wih_b"], np.float64)
    whh_f = _round_bf16(ref_p["whh_f"])       # kernel uses bf16 recurrent weights
    whh_b = _round_bf16(ref_p["whh_b"])
    b_f = np.asarray(ref_p["b_f"], np.float64)
    b_b = np.asarray(ref_p["b_b"], np.float64)
    T = x.shape[0]
    U = whh_f.shape[0]

    def run(wih, whh, b, reverse):
        h = np.zeros((1, U))
        c = np.zeros((1, U))
        out = np.zeros((T, U))
        order = range(T - 1, -1, -1) if reverse else range(T)
        for t in order:
            g = x[t:t + 1] @ wih + b + h @ whh
            i = 1.0 / (1.0 + np.exp(-g[:, 0:U]))
            f = 1.0 / (1.0 + np.exp(-g[:, U:2 * U]))
            gg = np.tanh(g[:, 2 * U:3 * U])
            o = 1.0 / (1.0 + np.exp(-g[:, 3 * U:4 * U]))
            c = f * c + i * gg
            h = o * np.tanh(c)
            out[t] = h[0]
        return out, h, c

    of, hf, cf = run(wih_f, whh_f, b_f, False)
    ob, hb, cb = run(wih_b, whh_b, b_b, True)
    out = np.concatenate([of, ob], axis=1)
    sent = out[gather_idx]
    hn = np.concatenate([hf, hb], axis=0)
    cn = np.concatenate([cf, cb], axis=0)
    return out, sent, hn, cn


if __name__ == "__main__":
    key = jax.random.PRNGKey(0)
    k_par, k_x = jax.random.split(key)

    input_size = 32
    hidden_size = 32            # bidirectional -> U = 16 per direction, 8U = 128 lanes
    seq_len = 16

    params = init_params(k_par, input_size, hidden_size=hidden_size)

    # module input is (batch=1, T, D) batch_first
    x = jax.random.normal(k_x, (1, seq_len, input_size), dtype=jnp.float32)
    eos_position_list = [4, 8, 12, 16]          # 4 sentences

    word_out, sent_out, hidden, _ = forward(params, x, eos_position_list)
    word_out = jax.block_until_ready(word_out)
    sent_out = jax.block_until_ready(sent_out)
    h_n, c_n = hidden
    h_n = jax.block_until_ready(h_n)
    c_n = jax.block_until_ready(c_n)

    assert word_out.shape == (1, seq_len, hidden_size)
    assert sent_out.shape == (1, len(eos_position_list), hidden_size)
    assert h_n.shape == (2, 1, hidden_size // 2)
    assert c_n.shape == (2, 1, hidden_size // 2)

    # numerical sanity check vs. host float64 reference (recurrent weights are
    # bf16-quantized in both; tolerance additionally covers per-step bf16 h
    # rounding and default MXU precision of the hoisted input projection).
    gidx = np.asarray([min(max(e - 1, 0), seq_len - 1) for e in eos_position_list],
                      dtype=np.int32)
    ref_out, ref_sent, ref_hn, ref_cn = _reference_forward(
        params["ref"], np.asarray(x[0]), gidx)
    np.testing.assert_allclose(np.asarray(word_out[0]), ref_out, atol=1e-2, rtol=1e-2)
    np.testing.assert_allclose(np.asarray(sent_out[0]), ref_sent, atol=1e-2, rtol=1e-2)
    np.testing.assert_allclose(np.asarray(h_n[:, 0, :]), ref_hn, atol=1e-2, rtol=1e-2)
    np.testing.assert_allclose(np.asarray(c_n[:, 0, :]), ref_cn, atol=1e-2, rtol=1e-2)

    print("KERNEL_OK")
</pallas_src>

<mosaic_0001>
module attributes {stable_mosaic.version = 11 : i64} {
  func.func @_bilstm_encoder_kernel(%arg0: memref<16x32xf32, #tpu.memory_space<vmem>>, %arg1: memref<32x128xf32, #tpu.memory_space<vmem>>, %arg2: memref<32x128xbf16, #tpu.memory_space<vmem>>, %arg3: memref<1x128xf32, #tpu.memory_space<vmem>>, %arg4: memref<4xi32, #tpu.memory_space<smem>>, %arg5: memref<16x32xf32, #tpu.memory_space<vmem>>, %arg6: memref<4x32xf32, #tpu.memory_space<vmem>>, %arg7: memref<2x16xf32, #tpu.memory_space<vmem>>, %arg8: memref<2x16xf32, #tpu.memory_space<vmem>>, %arg9: memref<16x128xf32, #tpu.memory_space<vmem>>) attributes {dimension_semantics = [], scalar_prefetch = 0 : i64, scratch_operands = 1 : i64, tpu.core_type = #tpu.core_type<tc>} {
    %c0 = arith.constant 0 : index
    %c0_0 = arith.constant 0 : index
    %0 = vector.load %arg0[%c0, %c0_0] : memref<16x32xf32, #tpu.memory_space<vmem>>, vector<16x32xf32>
    %c0_1 = arith.constant 0 : index
    %c0_2 = arith.constant 0 : index
    %1 = vector.load %arg1[%c0_1, %c0_2] : memref<32x128xf32, #tpu.memory_space<vmem>>, vector<32x128xf32>
    %cst = arith.constant dense<0.000000e+00> : vector<16x128xf32>
    %2 = tpu.matmul %0, %1, %cst {dimension_numbers = #tpu.dot_dimension_numbers<[1], [0], [0], [1], [0, 0, 1, 1], [], []>} : vector<16x32xf32>, vector<32x128xf32>, vector<16x128xf32> -> vector<16x128xf32>
    %c0_3 = arith.constant 0 : index
    %c0_4 = arith.constant 0 : index
    %3 = vector.load %arg3[%c0_3, %c0_4] : memref<1x128xf32, #tpu.memory_space<vmem>>, vector<1x128xf32>
    %4 = vector.broadcast %3 : vector<1x128xf32> to vector<16x128xf32>
    %5 = arith.addf %2, %4 : vector<16x128xf32>
    %c0_5 = arith.constant 0 : index
    %c0_6 = arith.constant 0 : index
    %6 = vector.load %arg9[%c0_5, %c0_6] : memref<16x128xf32, #tpu.memory_space<vmem>>, vector<16x128xf32>
    tpu.vector_store %arg9[%c0_5, %c0_6], %5 {strides = array<i32>} : memref<16x128xf32, #tpu.memory_space<vmem>>, vector<16x128xf32>,
    %7 = tpu.iota {dimensions = array<i32: 1>} : vector<1x128xi32>
    %c0_i32 = arith.constant 0 : i32
    %8 = vector.broadcast %c0_i32 : i32 to vector<1x128xi32>
    %9 = arith.cmpi sge, %7, %8 : vector<1x128xi32>
    %c16_i32 = arith.constant 16 : i32
    %10 = vector.broadcast %c16_i32 : i32 to vector<1x128xi32>
    %11 = arith.cmpi slt, %7, %10 : vector<1x128xi32>
    %12 = arith.andi %9, %11 : vector<1x128xi1>
    %c32_i32 = arith.constant 32 : i32
    %13 = vector.broadcast %c32_i32 : i32 to vector<1x128xi32>
    %14 = arith.cmpi sge, %7, %13 : vector<1x128xi32>
    %c48_i32 = arith.constant 48 : i32
    %15 = vector.broadcast %c48_i32 : i32 to vector<1x128xi32>
    %16 = arith.cmpi slt, %7, %15 : vector<1x128xi32>
    %17 = arith.andi %14, %16 : vector<1x128xi1>
    %18 = arith.ori %12, %17 : vector<1x128xi1>
    %c64_i32 = arith.constant 64 : i32
    %19 = vector.broadcast %c64_i32 : i32 to vector<1x128xi32>
    %20 = arith.cmpi sge, %7, %19 : vector<1x128xi32>
    %c80_i32 = arith.constant 80 : i32
    %21 = vector.broadcast %c80_i32 : i32 to vector<1x128xi32>
    %22 = arith.cmpi slt, %7, %21 : vector<1x128xi32>
    %23 = arith.andi %20, %22 : vector<1x128xi1>
    %24 = arith.ori %18, %23 : vector<1x128xi1>
    %c96_i32 = arith.constant 96 : i32
    %25 = vector.broadcast %c96_i32 : i32 to vector<1x128xi32>
    %26 = arith.cmpi sge, %7, %25 : vector<1x128xi32>
    %c112_i32 = arith.constant 112 : i32
    %27 = vector.broadcast %c112_i32 : i32 to vector<1x128xi32>
    %28 = arith.cmpi slt, %7, %27 : vector<1x128xi32>
    %29 = arith.andi %26, %28 : vector<1x128xi1>
    %30 = arith.ori %24, %29 : vector<1x128xi1>
    %c64_i32_7 = arith.constant 64 : i32
    %31 = vector.broadcast %c64_i32_7 : i32 to vector<1x128xi32>
    %32 = arith.cmpi sge, %7, %31 : vector<1x128xi32>
    %c96_i32_8 = arith.constant 96 : i32
    %33 = vector.broadcast %c96_i32_8 : i32 to vector<1x128xi32>
    %34 = arith.cmpi slt, %7, %33 : vector<1x128xi32>
    %35 = arith.andi %32, %34 : vector<1x128xi1>
    %c0_9 = arith.constant 0 : index
    %c0_10 = arith.constant 0 : index
    %36 = vector.load %arg2[%c0_9, %c0_10] : memref<32x128xbf16, #tpu.memory_space<vmem>>, vector<32x128xbf16>
    %cst_11 = arith.constant 0.000000e+00 : f32
    %37 = vector.broadcast %cst_11 : f32 to vector<1x32xf32>
    %cst_12 = arith.constant 0.000000e+00 : f32
    %38 = vector.broadcast %cst_12 : f32 to vector<1x32xf32>
    %c0_i32_13 = arith.constant 0 : i32
    %c15_i32 = arith.constant 15 : i32
    %39 = arith.subi %c15_i32, %c0_i32_13 : i32
    %40 = arith.index_cast %c0_i32_13 : i32 to index
    %c0_14 = arith.constant 0 : index
    %41 = vector.load %arg9[%40, %c0_14] : memref<16x128xf32, #tpu.memory_space<vmem>>, vector<1x128xf32>
    %42 = arith.index_cast %39 : i32 to index
    %c0_15 = arith.constant 0 : index
    %43 = vector.load %arg9[%42, %c0_15] : memref<16x128xf32, #tpu.memory_space<vmem>>, vector<1x128xf32>
    %44 = arith.select %30, %41, %43 : vector<1x128xi1>, vector<1x128xf32>
    %45 = arith.truncf %37 : vector<1x32xf32> to vector<1x32xbf16>
    %cst_16 = arith.constant dense<0.000000e+00> : vector<1x128xf32>
    %46 = tpu.matmul %45, %36, %cst_16 {dimension_numbers = #tpu.dot_dimension_numbers<[1], [0], [0], [1], [0, 0, 1, 1], [], []>} : vector<1x32xbf16>, vector<32x128xbf16>, vector<1x128xf32> -> vector<1x128xf32>
    %47 = arith.addf %44, %46 : vector<1x128xf32>
    %cst_17 = arith.constant 5.000000e-01 : f32
    %48 = vector.broadcast %cst_17 : f32 to vector<1x128xf32>
    %49 = arith.mulf %48, %47 : vector<1x128xf32>
    %50 = arith.select %35, %47, %49 : vector<1x128xi1>, vector<1x128xf32>
    %51 = math.tanh %50 : vector<1x128xf32>
    %cst_18 = arith.constant 5.000000e-01 : f32
    %52 = vector.broadcast %cst_18 : f32 to vector<1x128xf32>
    %53 = arith.mulf %52, %51 : vector<1x128xf32>
    %cst_19 = arith.constant 5.000000e-01 : f32
    %54 = vector.broadcast %cst_19 : f32 to vector<1x128xf32>
    %55 = arith.addf %53, %54 : vector<1x128xf32>
    %56 = arith.select %35, %51, %55 : vector<1x128xi1>, vector<1x128xf32>
    %57 = vector.extract_strided_slice %56 {offsets = [0, 0], sizes = [1, 32], strides = [1, 1]} : vector<1x128xf32> to vector<1x32xf32>
    %58 = vector.extract_strided_slice %56 {offsets = [0, 32], sizes = [1, 32], strides = [1, 1]} : vector<1x128xf32> to vector<1x32xf32>
    %59 = vector.extract_strided_slice %56 {offsets = [0, 64], sizes = [1, 32], strides = [1, 1]} : vector<1x128xf32> to vector<1x32xf32>
    %60 = vector.extract_strided_slice %56 {offsets = [0, 96], sizes = [1, 32], strides = [1, 1]} : vector<1x128xf32> to vector<1x32xf32>
    %61 = arith.mulf %58, %38 : vector<1x32xf32>
    %62 = arith.mulf %57, %59 : vector<1x32xf32>
    %63 = arith.addf %61, %62 : vector<1x32xf32>
    %64 = math.tanh %63 : vector<1x32xf32>
    %65 = arith.mulf %60, %64 : vector<1x32xf32>
    %66 = vector.extract_strided_slice %65 {offsets = [0, 0], sizes = [1, 16], strides = [1, 1]} : vector<1x32xf32> to vector<1x16xf32>
    %67 = arith.index_cast %c0_i32_13 : i32 to index
    %c0_20 = arith.constant 0 : index
    %68 = vector.load %arg5[%67, %c0_20] : memref<16x32xf32, #tpu.memory_space<vmem>>, vector<1x16xf32>
    tpu.vector_store %arg5[%67, %c0_20], %66 {strides = array<i32>} : memref<16x32xf32, #tpu.memory_space<vmem>>, vector<1x16xf32>,
    %69 = vector.extract_strided_slice %65 {offsets = [0, 16], sizes = [1, 16], strides = [1, 1]} : vector<1x32xf32> to vector<1x16xf32>
    %70 = arith.index_cast %39 : i32 to index
    %c16 = arith.constant 16 : index
    %71 = vector.load %arg5[%70, %c16] : memref<16x32xf32, #tpu.memory_space<vmem>>, vector<1x16xf32>
    tpu.vector_store %arg5[%70, %c16], %69 {strides = array<i32>} : memref<16x32xf32, #tpu.memory_space<vmem>>, vector<1x16xf32>,
    %c1_i32 = arith.constant 1 : i32
    %c15_i32_21 = arith.constant 15 : i32
    %72 = arith.subi %c15_i32_21, %c1_i32 : i32
    %73 = arith.index_cast %c1_i32 : i32 to index
    %c0_22 = arith.constant 0 : index
    %74 = vector.load %arg9[%73, %c0_22] : memref<16x128xf32, #tpu.memory_space<vmem>>, vector<1x128xf32>
    %75 = arith.index_cast %72 : i32 to index
    %c0_23 = arith.constant 0 : index
    %76 = vector.load %arg9[%75, %c0_23] : memref<16x128xf32, #tpu.memory_space<vmem>>, vector<1x128xf32>
    %77 = arith.select %30, %74, %76 : vector<1x128xi1>, vector<1x128xf32>
    %78 = arith.truncf %65 : vector<1x32xf32> to vector<1x32xbf16>
    %cst_24 = arith.constant dense<0.000000e+00> : vector<1x128xf32>
    %79 = tpu.matmul %78, %36, %cst_24 {dimension_numbers = #tpu.dot_dimension_numbers<[1], [0], [0], [1], [0, 0, 1, 1], [], []>} : vector<1x32xbf16>, vector<32x128xbf16>, vector<1x128xf32> -> vector<1x128xf32>
    %80 = arith.addf %77, %79 : vector<1x128xf32>
    %cst_25 = arith.constant 5.000000e-01 : f32
    %81 = vector.broadcast %cst_25 : f32 to vector<1x128xf32>
    %82 = arith.mulf %81, %80 : vector<1x128xf32>
    %83 = arith.select %35, %80, %82 : vector<1x128xi1>, vector<1x128xf32>
    %84 = math.tanh %83 : vector<1x128xf32>
    %cst_26 = arith.constant 5.000000e-01 : f32
    %85 = vector.broadcast %cst_26 : f32 to vector<1x128xf32>
    %86 = arith.mulf %85, %84 : vector<1x128xf32>
    %cst_27 = arith.constant 5.000000e-01 : f32
    %87 = vector.broadcast %cst_27 : f32 to vector<1x128xf32>
    %88 = arith.addf %86, %87 : vector<1x128xf32>
    %89 = arith.select %35, %84, %88 : vector<1x128xi1>, vector<1x128xf32>
    %90 = vector.extract_strided_slice %89 {offsets = [0, 0], sizes = [1, 32], strides = [1, 1]} : vector<1x128xf32> to vector<1x32xf32>
    %91 = vector.extract_strided_slice %89 {offsets = [0, 32], sizes = [1, 32], strides = [1, 1]} : vector<1x128xf32> to vector<1x32xf32>
    %92 = vector.extract_strided_slice %89 {offsets = [0, 64], sizes = [1, 32], strides = [1, 1]} : vector<1x128xf32> to vector<1x32xf32>
    %93 = vector.extract_strided_slice %89 {offsets = [0, 96], sizes = [1, 32], strides = [1, 1]} : vector<1x128xf32> to vector<1x32xf32>
    %94 = arith.mulf %91, %63 : vector<1x32xf32>
    %95 = arith.mulf %90, %92 : vector<1x32xf32>
    %96 = arith.addf %94, %95 : vector<1x32xf32>
    %97 = math.tanh %96 : vector<1x32xf32>
    %98 = arith.mulf %93, %97 : vector<1x32xf32>
    %99 = vector.extract_strided_slice %98 {offsets = [0, 0], sizes = [1, 16], strides = [1, 1]} : vector<1x32xf32> to vector<1x16xf32>
    %100 = arith.index_cast %c1_i32 : i32 to index
    %c0_28 = arith.constant 0 : index
    %101 = vector.load %arg5[%100, %c0_28] : memref<16x32xf32, #tpu.memory_space<vmem>>, vector<1x16xf32>
    tpu.vector_store %arg5[%100, %c0_28], %99 {strides = array<i32>} : memref<16x32xf32, #tpu.memory_space<vmem>>, vector<1x16xf32>,
    %102 = vector.extract_strided_slice %98 {offsets = [0, 16], sizes = [1, 16], strides = [1, 1]} : vector<1x32xf32> to vector<1x16xf32>
    %103 = arith.index_cast %72 : i32 to index
    %c16_29 = arith.constant 16 : index
    %104 = vector.load %arg5[%103, %c16_29] : memref<16x32xf32, #tpu.memory_space<vmem>>, vector<1x16xf32>
    tpu.vector_store %arg5[%103, %c16_29], %102 {strides = array<i32>} : memref<16x32xf32, #tpu.memory_space<vmem>>, vector<1x16xf32>,
    %c2_i32 = arith.constant 2 : i32
    %c15_i32_30 = arith.constant 15 : i32
    %105 = arith.subi %c15_i32_30, %c2_i32 : i32
    %106 = arith.index_cast %c2_i32 : i32 to index
    %c0_31 = arith.constant 0 : index
    %107 = vector.load %arg9[%106, %c0_31] : memref<16x128xf32, #tpu.memory_space<vmem>>, vector<1x128xf32>
    %108 = arith.index_cast %105 : i32 to index
    %c0_32 = arith.constant 0 : index
    %109 = vector.load %arg9[%108, %c0_32] : memref<16x128xf32, #tpu.memory_space<vmem>>, vector<1x128xf32>
    %110 = arith.select %30, %107, %109 : vector<1x128xi1>, vector<1x128xf32>
    %111 = arith.truncf %98 : vector<1x32xf32> to vector<1x32xbf16>
    %cst_33 = arith.constant dense<0.000000e+00> : vector<1x128xf32>
    %112 = tpu.matmul %111, %36, %cst_33 {dimension_numbers = #tpu.dot_dimension_numbers<[1], [0], [0], [1], [0, 0, 1, 1], [], []>} : vector<1x32xbf16>, vector<32x128xbf16>, vector<1x128xf32> -> vector<1x128xf32>
    %113 = arith.addf %110, %112 : vector<1x128xf32>
    %cst_34 = arith.constant 5.000000e-01 : f32
    %114 = vector.broadcast %cst_34 : f32 to vector<1x128xf32>
    %115 = arith.mulf %114, %113 : vector<1x128xf32>
    %116 = arith.select %35, %113, %115 : vector<1x128xi1>, vector<1x128xf32>
    %117 = math.tanh %116 : vector<1x128xf32>
    %cst_35 = arith.constant 5.000000e-01 : f32
    %118 = vector.broadcast %cst_35 : f32 to vector<1x128xf32>
    %119 = arith.mulf %118, %117 : vector<1x128xf32>
    %cst_36 = arith.constant 5.000000e-01 : f32
    %120 = vector.broadcast %cst_36 : f32 to vector<1x128xf32>
    %121 = arith.addf %119, %120 : vector<1x128xf32>
    %122 = arith.select %35, %117, %121 : vector<1x128xi1>, vector<1x128xf32>
    %123 = vector.extract_strided_slice %122 {offsets = [0, 0], sizes = [1, 32], strides = [1, 1]} : vector<1x128xf32> to vector<1x32xf32>
    %124 = vector.extract_strided_slice %122 {offsets = [0, 32], sizes = [1, 32], strides = [1, 1]} : vector<1x128xf32> to vector<1x32xf32>
    %125 = vector.extract_strided_slice %122 {offsets = [0, 64], sizes = [1, 32], strides = [1, 1]} : vector<1x128xf32> to vector<1x32xf32>
    %126 = vector.extract_strided_slice %122 {offsets = [0, 96], sizes = [1, 32], strides = [1, 1]} : vector<1x128xf32> to vector<1x32xf32>
    %127 = arith.mulf %124, %96 : vector<1x32xf32>
    %128 = arith.mulf %123, %125 : vector<1x32xf32>
    %129 = arith.addf %127, %128 : vector<1x32xf32>
    %130 = math.tanh %129 : vector<1x32xf32>
    %131 = arith.mulf %126, %130 : vector<1x32xf32>
    %132 = vector.extract_strided_slice %131 {offsets = [0, 0], sizes = [1, 16], strides = [1, 1]} : vector<1x32xf32> to vector<1x16xf32>
    %133 = arith.index_cast %c2_i32 : i32 to index
    %c0_37 = arith.constant 0 : index
    %134 = vector.load %arg5[%133, %c0_37] : memref<16x32xf32, #tpu.memory_space<vmem>>, vector<1x16xf32>
    tpu.vector_store %arg5[%133, %c0_37], %132 {strides = array<i32>} : memref<16x32xf32, #tpu.memory_space<vmem>>, vector<1x16xf32>,
    %135 = vector.extract_strided_slice %131 {offsets = [0, 16], sizes = [1, 16], strides = [1, 1]} : vector<1x32xf32> to vector<1x16xf32>
    %136 = arith.index_cast %105 : i32 to index
    %c16_38 = arith.constant 16 : index
    %137 = vector.load %arg5[%136, %c16_38] : memref<16x32xf32, #tpu.memory_space<vmem>>, vector<1x16xf32>
    tpu.vector_store %arg5[%136, %c16_38], %135 {strides = array<i32>} : memref<16x32xf32, #tpu.memory_space<vmem>>, vector<1x16xf32>,
    %c3_i32 = arith.constant 3 : i32
    %c15_i32_39 = arith.constant 15 : i32
    %138 = arith.subi %c15_i32_39, %c3_i32 : i32
    %139 = arith.index_cast %c3_i32 : i32 to index
    %c0_40 = arith.constant 0 : index
    %140 = vector.load %arg9[%139, %c0_40] : memref<16x128xf32, #tpu.memory_space<vmem>>, vector<1x128xf32>
    %141 = arith.index_cast %138 : i32 to index
    %c0_41 = arith.constant 0 : index
    %142 = vector.load %arg9[%141, %c0_41] : memref<16x128xf32, #tpu.memory_space<vmem>>, vector<1x128xf32>
    %143 = arith.select %30, %140, %142 : vector<1x128xi1>, vector<1x128xf32>
    %144 = arith.truncf %131 : vector<1x32xf32> to vector<1x32xbf16>
    %cst_42 = arith.constant dense<0.000000e+00> : vector<1x128xf32>
    %145 = tpu.matmul %144, %36, %cst_42 {dimension_numbers = #tpu.dot_dimension_numbers<[1], [0], [0], [1], [0, 0, 1, 1], [], []>} : vector<1x32xbf16>, vector<32x128xbf16>, vector<1x128xf32> -> vector<1x128xf32>
    %146 = arith.addf %143, %145 : vector<1x128xf32>
    %cst_43 = arith.constant 5.000000e-01 : f32
    %147 = vector.broadcast %cst_43 : f32 to vector<1x128xf32>
    %148 = arith.mulf %147, %146 : vector<1x128xf32>
    %149 = arith.select %35, %146, %148 : vector<1x128xi1>, vector<1x128xf32>
    %150 = math.tanh %149 : vector<1x128xf32>
    %cst_44 = arith.constant 5.000000e-01 : f32
    %151 = vector.broadcast %cst_44 : f32 to vector<1x128xf32>
    %152 = arith.mulf %151, %150 : vector<1x128xf32>
    %cst_45 = arith.constant 5.000000e-01 : f32
    %153 = vector.broadcast %cst_45 : f32 to vector<1x128xf32>
    %154 = arith.addf %152, %153 : vector<1x128xf32>
    %155 = arith.select %35, %150, %154 : vector<1x128xi1>, vector<1x128xf32>
    %156 = vector.extract_strided_slice %155 {offsets = [0, 0], sizes = [1, 32], strides = [1, 1]} : vector<1x128xf32> to vector<1x32xf32>
    %157 = vector.extract_strided_slice %155 {offsets = [0, 32], sizes = [1, 32], strides = [1, 1]} : vector<1x128xf32> to vector<1x32xf32>
    %158 = vector.extract_strided_slice %155 {offsets = [0, 64], sizes = [1, 32], strides = [1, 1]} : vector<1x128xf32> to vector<1x32xf32>
    %159 = vector.extract_strided_slice %155 {offsets = [0, 96], sizes = [1, 32], strides = [1, 1]} : vector<1x128xf32> to vector<1x32xf32>
    %160 = arith.mulf %157, %129 : vector<1x32xf32>
    %161 = arith.mulf %156, %158 : vector<1x32xf32>
    %162 = arith.addf %160, %161 : vector<1x32xf32>
    %163 = math.tanh %162 : vector<1x32xf32>
    %164 = arith.mulf %159, %163 : vector<1x32xf32>
    %165 = vector.extract_strided_slice %164 {offsets = [0, 0], sizes = [1, 16], strides = [1, 1]} : vector<1x32xf32> to vector<1x16xf32>
    %166 = arith.index_cast %c3_i32 : i32 to index
    %c0_46 = arith.constant 0 : index
    %167 = vector.load %arg5[%166, %c0_46] : memref<16x32xf32, #tpu.memory_space<vmem>>, vector<1x16xf32>
    tpu.vector_store %arg5[%166, %c0_46], %165 {strides = array<i32>} : memref<16x32xf32, #tpu.memory_space<vmem>>, vector<1x16xf32>,
    %168 = vector.extract_strided_slice %164 {offsets = [0, 16], sizes = [1, 16], strides = [1, 1]} : vector<1x32xf32> to vector<1x16xf32>
    %169 = arith.index_cast %138 : i32 to index
    %c16_47 = arith.constant 16 : index
    %170 = vector.load %arg5[%169, %c16_47] : memref<16x32xf32, #tpu.memory_space<vmem>>, vector<1x16xf32>
    tpu.vector_store %arg5[%169, %c16_47], %168 {strides = array<i32>} : memref<16x32xf32, #tpu.memory_space<vmem>>, vector<1x16xf32>,
    %c4_i32 = arith.constant 4 : i32
    %c15_i32_48 = arith.constant 15 : i32
    %171 = arith.subi %c15_i32_48, %c4_i32 : i32
    %172 = arith.index_cast %c4_i32 : i32 to index
    %c0_49 = arith.constant 0 : index
    %173 = vector.load %arg9[%172, %c0_49] : memref<16x128xf32, #tpu.memory_space<vmem>>, vector<1x128xf32>
    %174 = arith.index_cast %171 : i32 to index
    %c0_50 = arith.constant 0 : index
    %175 = vector.load %arg9[%174, %c0_50] : memref<16x128xf32, #tpu.memory_space<vmem>>, vector<1x128xf32>
    %176 = arith.select %30, %173, %175 : vector<1x128xi1>, vector<1x128xf32>
    %177 = arith.truncf %164 : vector<1x32xf32> to vector<1x32xbf16>
    %cst_51 = arith.constant dense<0.000000e+00> : vector<1x128xf32>
    %178 = tpu.matmul %177, %36, %cst_51 {dimension_numbers = #tpu.dot_dimension_numbers<[1], [0], [0], [1], [0, 0, 1, 1], [], []>} : vector<1x32xbf16>, vector<32x128xbf16>, vector<1x128xf32> -> vector<1x128xf32>
    %179 = arith.addf %176, %178 : vector<1x128xf32>
    %cst_52 = arith.constant 5.000000e-01 : f32
    %180 = vector.broadcast %cst_52 : f32 to vector<1x128xf32>
    %181 = arith.mulf %180, %179 : vector<1x128xf32>
    %182 = arith.select %35, %179, %181 : vector<1x128xi1>, vector<1x128xf32>
    %183 = math.tanh %182 : vector<1x128xf32>
    %cst_53 = arith.constant 5.000000e-01 : f32
    %184 = vector.broadcast %cst_53 : f32 to vector<1x128xf32>
    %185 = arith.mulf %184, %183 : vector<1x128xf32>
    %cst_54 = arith.constant 5.000000e-01 : f32
    %186 = vector.broadcast %cst_54 : f32 to vector<1x128xf32>
    %187 = arith.addf %185, %186 : vector<1x128xf32>
    %188 = arith.select %35, %183, %187 : vector<1x128xi1>, vector<1x128xf32>
    %189 = vector.extract_strided_slice %188 {offsets = [0, 0], sizes = [1, 32], strides = [1, 1]} : vector<1x128xf32> to vector<1x32xf32>
    %190 = vector.extract_strided_slice %188 {offsets = [0, 32], sizes = [1, 32], strides = [1, 1]} : vector<1x128xf32> to vector<1x32xf32>
    %191 = vector.extract_strided_slice %188 {offsets = [0, 64], sizes = [1, 32], strides = [1, 1]} : vector<1x128xf32> to vector<1x32xf32>
    %192 = vector.extract_strided_slice %188 {offsets = [0, 96], sizes = [1, 32], strides = [1, 1]} : vector<1x128xf32> to vector<1x32xf32>
    %193 = arith.mulf %190, %162 : vector<1x32xf32>
    %194 = arith.mulf %189, %191 : vector<1x32xf32>
    %195 = arith.addf %193, %194 : vector<1x32xf32>
    %196 = math.tanh %195 : vector<1x32xf32>
    %197 = arith.mulf %192, %196 : vector<1x32xf32>
    %198 = vector.extract_strided_slice %197 {offsets = [0, 0], sizes = [1, 16], strides = [1, 1]} : vector<1x32xf32> to vector<1x16xf32>
    %199 = arith.index_cast %c4_i32 : i32 to index
    %c0_55 = arith.constant 0 : index
    %200 = vector.load %arg5[%199, %c0_55] : memref<16x32xf32, #tpu.memory_space<vmem>>, vector<1x16xf32>
    tpu.vector_store %arg5[%199, %c0_55], %198 {strides = array<i32>} : memref<16x32xf32, #tpu.memory_space<vmem>>, vector<1x16xf32>,
    %201 = vector.extract_strided_slice %197 {offsets = [0, 16], sizes = [1, 16], strides = [1, 1]} : vector<1x32xf32> to vector<1x16xf32>
    %202 = arith.index_cast %171 : i32 to index
    %c16_56 = arith.constant 16 : index
    %203 = vector.load %arg5[%202, %c16_56] : memref<16x32xf32, #tpu.memory_space<vmem>>, vector<1x16xf32>
    tpu.vector_store %arg5[%202, %c16_56], %201 {strides = array<i32>} : memref<16x32xf32, #tpu.memory_space<vmem>>, vector<1x16xf32>,
    %c5_i32 = arith.constant 5 : i32
    %c15_i32_57 = arith.constant 15 : i32
    %204 = arith.subi %c15_i32_57, %c5_i32 : i32
    %205 = arith.index_cast %c5_i32 : i32 to index
    %c0_58 = arith.constant 0 : index
    %206 = vector.load %arg9[%205, %c0_58] : memref<16x128xf32, #tpu.memory_space<vmem>>, vector<1x128xf32>
    %207 = arith.index_cast %204 : i32 to index
    %c0_59 = arith.constant 0 : index
    %208 = vector.load %arg9[%207, %c0_59] : memref<16x128xf32, #tpu.memory_space<vmem>>, vector<1x128xf32>
    %209 = arith.select %30, %206, %208 : vector<1x128xi1>, vector<1x128xf32>
    %210 = arith.truncf %197 : vector<1x32xf32> to vector<1x32xbf16>
    %cst_60 = arith.constant dense<0.000000e+00> : vector<1x128xf32>
    %211 = tpu.matmul %210, %36, %cst_60 {dimension_numbers = #tpu.dot_dimension_numbers<[1], [0], [0], [1], [0, 0, 1, 1], [], []>} : vector<1x32xbf16>, vector<32x128xbf16>, vector<1x128xf32> -> vector<1x128xf32>
    %212 = arith.addf %209, %211 : vector<1x128xf32>
    %cst_61 = arith.constant 5.000000e-01 : f32
    %213 = vector.broadcast %cst_61 : f32 to vector<1x128xf32>
    %214 = arith.mulf %213, %212 : vector<1x128xf32>
    %215 = arith.select %35, %212, %214 : vector<1x128xi1>, vector<1x128xf32>
    %216 = math.tanh %215 : vector<1x128xf32>
    %cst_62 = arith.constant 5.000000e-01 : f32
    %217 = vector.broadcast %cst_62 : f32 to vector<1x128xf32>
    %218 = arith.mulf %217, %216 : vector<1x128xf32>
    %cst_63 = arith.constant 5.000000e-01 : f32
    %219 = vector.broadcast %cst_63 : f32 to vector<1x128xf32>
    %220 = arith.addf %218, %219 : vector<1x128xf32>
    %221 = arith.select %35, %216, %220 : vector<1x128xi1>, vector<1x128xf32>
    %222 = vector.extract_strided_slice %221 {offsets = [0, 0], sizes = [1, 32], strides = [1, 1]} : vector<1x128xf32> to vector<1x32xf32>
    %223 = vector.extract_strided_slice %221 {offsets = [0, 32], sizes = [1, 32], strides = [1, 1]} : vector<1x128xf32> to vector<1x32xf32>
    %224 = vector.extract_strided_slice %221 {offsets = [0, 64], sizes = [1, 32], strides = [1, 1]} : vector<1x128xf32> to vector<1x32xf32>
    %225 = vector.extract_strided_slice %221 {offsets = [0, 96], sizes = [1, 32], strides = [1, 1]} : vector<1x128xf32> to vector<1x32xf32>
    %226 = arith.mulf %223, %195 : vector<1x32xf32>
    %227 = arith.mulf %222, %224 : vector<1x32xf32>
    %228 = arith.addf %226, %227 : vector<1x32xf32>
    %229 = math.tanh %228 : vector<1x32xf32>
    %230 = arith.mulf %225, %229 : vector<1x32xf32>
    %231 = vector.extract_strided_slice %230 {offsets = [0, 0], sizes = [1, 16], strides = [1, 1]} : vector<1x32xf32> to vector<1x16xf32>
    %232 = arith.index_cast %c5_i32 : i32 to index
    %c0_64 = arith.constant 0 : index
    %233 = vector.load %arg5[%232, %c0_64] : memref<16x32xf32, #tpu.memory_space<vmem>>, vector<1x16xf32>
    tpu.vector_store %arg5[%232, %c0_64], %231 {strides = array<i32>} : memref<16x32xf32, #tpu.memory_space<vmem>>, vector<1x16xf32>,
    %234 = vector.extract_strided_slice %230 {offsets = [0, 16], sizes = [1, 16], strides = [1, 1]} : vector<1x32xf32> to vector<1x16xf32>
    %235 = arith.index_cast %204 : i32 to index
    %c16_65 = arith.constant 16 : index
    %236 = vector.load %arg5[%235, %c16_65] : memref<16x32xf32, #tpu.memory_space<vmem>>, vector<1x16xf32>
    tpu.vector_store %arg5[%235, %c16_65], %234 {strides = array<i32>} : memref<16x32xf32, #tpu.memory_space<vmem>>, vector<1x16xf32>,
    %c6_i32 = arith.constant 6 : i32
    %c15_i32_66 = arith.constant 15 : i32
    %237 = arith.subi %c15_i32_66, %c6_i32 : i32
    %238 = arith.index_cast %c6_i32 : i32 to index
    %c0_67 = arith.constant 0 : index
    %239 = vector.load %arg9[%238, %c0_67] : memref<16x128xf32, #tpu.memory_space<vmem>>, vector<1x128xf32>
    %240 = arith.index_cast %237 : i32 to index
    %c0_68 = arith.constant 0 : index
    %241 = vector.load %arg9[%240, %c0_68] : memref<16x128xf32, #tpu.memory_space<vmem>>, vector<1x128xf32>
    %242 = arith.select %30, %239, %241 : vector<1x128xi1>, vector<1x128xf32>
    %243 = arith.truncf %230 : vector<1x32xf32> to vector<1x32xbf16>
    %cst_69 = arith.constant dense<0.000000e+00> : vector<1x128xf32>
    %244 = tpu.matmul %243, %36, %cst_69 {dimension_numbers = #tpu.dot_dimension_numbers<[1], [0], [0], [1], [0, 0, 1, 1], [], []>} : vector<1x32xbf16>, vector<32x128xbf16>, vector<1x128xf32> -> vector<1x128xf32>
    %245 = arith.addf %242, %244 : vector<1x128xf32>
    %cst_70 = arith.constant 5.000000e-01 : f32
    %246 = vector.broadcast %cst_70 : f32 to vector<1x128xf32>
    %247 = arith.mulf %246, %245 : vector<1x128xf32>
    %248 = arith.select %35, %245, %247 : vector<1x128xi1>, vector<1x128xf32>
    %249 = math.tanh %248 : vector<1x128xf32>
    %cst_71 = arith.constant 5.000000e-01 : f32
    %250 = vector.broadcast %cst_71 : f32 to vector<1x128xf32>
    %251 = arith.mulf %250, %249 : vector<1x128xf32>
    %cst_72 = arith.constant 5.000000e-01 : f32
    %252 = vector.broadcast %cst_72 : f32 to vector<1x128xf32>
    %253 = arith.addf %251, %252 : vector<1x128xf32>
    %254 = arith.select %35, %249, %253 : vector<1x128xi1>, vector<1x128xf32>
    %255 = vector.extract_strided_slice %254 {offsets = [0, 0], sizes = [1, 32], strides = [1, 1]} : vector<1x128xf32> to vector<1x32xf32>
    %256 = vector.extract_strided_slice %254 {offsets = [0, 32], sizes = [1, 32], strides = [1, 1]} : vector<1x128xf32> to vector<1x32xf32>
    %257 = vector.extract_strided_slice %254 {offsets = [0, 64], sizes = [1, 32], strides = [1, 1]} : vector<1x128xf32> to vector<1x32xf32>
    %258 = vector.extract_strided_slice %254 {offsets = [0, 96], sizes = [1, 32], strides = [1, 1]} : vector<1x128xf32> to vector<1x32xf32>
    %259 = arith.mulf %256, %228 : vector<1x32xf32>
    %260 = arith.mulf %255, %257 : vector<1x32xf32>
    %261 = arith.addf %259, %260 : vector<1x32xf32>
    %262 = math.tanh %261 : vector<1x32xf32>
    %263 = arith.mulf %258, %262 : vector<1x32xf32>
    %264 = vector.extract_strided_slice %263 {offsets = [0, 0], sizes = [1, 16], strides = [1, 1]} : vector<1x32xf32> to vector<1x16xf32>
    %265 = arith.index_cast %c6_i32 : i32 to index
    %c0_73 = arith.constant 0 : index
    %266 = vector.load %arg5[%265, %c0_73] : memref<16x32xf32, #tpu.memory_space<vmem>>, vector<1x16xf32>
    tpu.vector_store %arg5[%265, %c0_73], %264 {strides = array<i32>} : memref<16x32xf32, #tpu.memory_space<vmem>>, vector<1x16xf32>,
    %267 = vector.extract_strided_slice %263 {offsets = [0, 16], sizes = [1, 16], strides = [1, 1]} : vector<1x32xf32> to vector<1x16xf32>
    %268 = arith.index_cast %237 : i32 to index
    %c16_74 = arith.constant 16 : index
    %269 = vector.load %arg5[%268, %c16_74] : memref<16x32xf32, #tpu.memory_space<vmem>>, vector<1x16xf32>
    tpu.vector_store %arg5[%268, %c16_74], %267 {strides = array<i32>} : memref<16x32xf32, #tpu.memory_space<vmem>>, vector<1x16xf32>,
    %c7_i32 = arith.constant 7 : i32
    %c15_i32_75 = arith.constant 15 : i32
    %270 = arith.subi %c15_i32_75, %c7_i32 : i32
    %271 = arith.index_cast %c7_i32 : i32 to index
    %c0_76 = arith.constant 0 : index
    %272 = vector.load %arg9[%271, %c0_76] : memref<16x128xf32, #tpu.memory_space<vmem>>, vector<1x128xf32>
    %273 = arith.index_cast %270 : i32 to index
    %c0_77 = arith.constant 0 : index
    %274 = vector.load %arg9[%273, %c0_77] : memref<16x128xf32, #tpu.memory_space<vmem>>, vector<1x128xf32>
    %275 = arith.select %30, %272, %274 : vector<1x128xi1>, vector<1x128xf32>
    %276 = arith.truncf %263 : vector<1x32xf32> to vector<1x32xbf16>
    %cst_78 = arith.constant dense<0.000000e+00> : vector<1x128xf32>
    %277 = tpu.matmul %276, %36, %cst_78 {dimension_numbers = #tpu.dot_dimension_numbers<[1], [0], [0], [1], [0, 0, 1, 1], [], []>} : vector<1x32xbf16>, vector<32x128xbf16>, vector<1x128xf32> -> vector<1x128xf32>
    %278 = arith.addf %275, %277 : vector<1x128xf32>
    %cst_79 = arith.constant 5.000000e-01 : f32
    %279 = vector.broadcast %cst_79 : f32 to vector<1x128xf32>
    %280 = arith.mulf %279, %278 : vector<1x128xf32>
    %281 = arith.select %35, %278, %280 : vector<1x128xi1>, vector<1x128xf32>
    %282 = math.tanh %281 : vector<1x128xf32>
    %cst_80 = arith.constant 5.000000e-01 : f32
    %283 = vector.broadcast %cst_80 : f32 to vector<1x128xf32>
    %284 = arith.mulf %283, %282 : vector<1x128xf32>
    %cst_81 = arith.constant 5.000000e-01 : f32
    %285 = vector.broadcast %cst_81 : f32 to vector<1x128xf32>
    %286 = arith.addf %284, %285 : vector<1x128xf32>
    %287 = arith.select %35, %282, %286 : vector<1x128xi1>, vector<1x128xf32>
    %288 = vector.extract_strided_slice %287 {offsets = [0, 0], sizes = [1, 32], strides = [1, 1]} : vector<1x128xf32> to vector<1x32xf32>
    %289 = vector.extract_strided_slice %287 {offsets = [0, 32], sizes = [1, 32], strides = [1, 1]} : vector<1x128xf32> to vector<1x32xf32>
    %290 = vector.extract_strided_slice %287 {offsets = [0, 64], sizes = [1, 32], strides = [1, 1]} : vector<1x128xf32> to vector<1x32xf32>
    %291 = vector.extract_strided_slice %287 {offsets = [0, 96], sizes = [1, 32], strides = [1, 1]} : vector<1x128xf32> to vector<1x32xf32>
    %292 = arith.mulf %289, %261 : vector<1x32xf32>
    %293 = arith.mulf %288, %290 : vector<1x32xf32>
    %294 = arith.addf %292, %293 : vector<1x32xf32>
    %295 = math.tanh %294 : vector<1x32xf32>
    %296 = arith.mulf %291, %295 : vector<1x32xf32>
    %297 = vector.extract_strided_slice %296 {offsets = [0, 0], sizes = [1, 16], strides = [1, 1]} : vector<1x32xf32> to vector<1x16xf32>
    %298 = arith.index_cast %c7_i32 : i32 to index
    %c0_82 = arith.constant 0 : index
    %299 = vector.load %arg5[%298, %c0_82] : memref<16x32xf32, #tpu.memory_space<vmem>>, vector<1x16xf32>
    tpu.vector_store %arg5[%298, %c0_82], %297 {strides = array<i32>} : memref<16x32xf32, #tpu.memory_space<vmem>>, vector<1x16xf32>,
    %300 = vector.extract_strided_slice %296 {offsets = [0, 16], sizes = [1, 16], strides = [1, 1]} : vector<1x32xf32> to vector<1x16xf32>
    %301 = arith.index_cast %270 : i32 to index
    %c16_83 = arith.constant 16 : index
    %302 = vector.load %arg5[%301, %c16_83] : memref<16x32xf32, #tpu.memory_space<vmem>>, vector<1x16xf32>
    tpu.vector_store %arg5[%301, %c16_83], %300 {strides = array<i32>} : memref<16x32xf32, #tpu.memory_space<vmem>>, vector<1x16xf32>,
    %c8_i32 = arith.constant 8 : i32
    %c15_i32_84 = arith.constant 15 : i32
    %303 = arith.subi %c15_i32_84, %c8_i32 : i32
    %304 = arith.index_cast %c8_i32 : i32 to index
    %c0_85 = arith.constant 0 : index
    %305 = vector.load %arg9[%304, %c0_85] : memref<16x128xf32, #tpu.memory_space<vmem>>, vector<1x128xf32>
    %306 = arith.index_cast %303 : i32 to index
    %c0_86 = arith.constant 0 : index
    %307 = vector.load %arg9[%306, %c0_86] : memref<16x128xf32, #tpu.memory_space<vmem>>, vector<1x128xf32>
    %308 = arith.select %30, %305, %307 : vector<1x128xi1>, vector<1x128xf32>
    %309 = arith.truncf %296 : vector<1x32xf32> to vector<1x32xbf16>
    %cst_87 = arith.constant dense<0.000000e+00> : vector<1x128xf32>
    %310 = tpu.matmul %309, %36, %cst_87 {dimension_numbers = #tpu.dot_dimension_numbers<[1], [0], [0], [1], [0, 0, 1, 1], [], []>} : vector<1x32xbf16>, vector<32x128xbf16>, vector<1x128xf32> -> vector<1x128xf32>
    %311 = arith.addf %308, %310 : vector<1x128xf32>
    %cst_88 = arith.constant 5.000000e-01 : f32
    %312 = vector.broadcast %cst_88 : f32 to vector<1x128xf32>
    %313 = arith.mulf %312, %311 : vector<1x128xf32>
    %314 = arith.select %35, %311, %313 : vector<1x128xi1>, vector<1x128xf32>
    %315 = math.tanh %314 : vector<1x128xf32>
    %cst_89 = arith.constant 5.000000e-01 : f32
    %316 = vector.broadcast %cst_89 : f32 to vector<1x128xf32>
    %317 = arith.mulf %316, %315 : vector<1x128xf32>
    %cst_90 = arith.constant 5.000000e-01 : f32
    %318 = vector.broadcast %cst_90 : f32 to vector<1x128xf32>
    %319 = arith.addf %317, %318 : vector<1x128xf32>
    %320 = arith.select %35, %315, %319 : vector<1x128xi1>, vector<1x128xf32>
    %321 = vector.extract_strided_slice %320 {offsets = [0, 0], sizes = [1, 32], strides = [1, 1]} : vector<1x128xf32> to vector<1x32xf32>
    %322 = vector.extract_strided_slice %320 {offsets = [0, 32], sizes = [1, 32], strides = [1, 1]} : vector<1x128xf32> to vector<1x32xf32>
    %323 = vector.extract_strided_slice %320 {offsets = [0, 64], sizes = [1, 32], strides = [1, 1]} : vector<1x128xf32> to vector<1x32xf32>
    %324 = vector.extract_strided_slice %320 {offsets = [0, 96], sizes = [1, 32], strides = [1, 1]} : vector<1x128xf32> to vector<1x32xf32>
    %325 = arith.mulf %322, %294 : vector<1x32xf32>
    %326 = arith.mulf %321, %323 : vector<1x32xf32>
    %327 = arith.addf %325, %326 : vector<1x32xf32>
    %328 = math.tanh %327 : vector<1x32xf32>
    %329 = arith.mulf %324, %328 : vector<1x32xf32>
    %330 = vector.extract_strided_slice %329 {offsets = [0, 0], sizes = [1, 16], strides = [1, 1]} : vector<1x32xf32> to vector<1x16xf32>
    %331 = arith.index_cast %c8_i32 : i32 to index
    %c0_91 = arith.constant 0 : index
    %332 = vector.load %arg5[%331, %c0_91] : memref<16x32xf32, #tpu.memory_space<vmem>>, vector<1x16xf32>
    tpu.vector_store %arg5[%331, %c0_91], %330 {strides = array<i32>} : memref<16x32xf32, #tpu.memory_space<vmem>>, vector<1x16xf32>,
    %333 = vector.extract_strided_slice %329 {offsets = [0, 16], sizes = [1, 16], strides = [1, 1]} : vector<1x32xf32> to vector<1x16xf32>
    %334 = arith.index_cast %303 : i32 to index
    %c16_92 = arith.constant 16 : index
    %335 = vector.load %arg5[%334, %c16_92] : memref<16x32xf32, #tpu.memory_space<vmem>>, vector<1x16xf32>
    tpu.vector_store %arg5[%334, %c16_92], %333 {strides = array<i32>} : memref<16x32xf32, #tpu.memory_space<vmem>>, vector<1x16xf32>,
    %c9_i32 = arith.constant 9 : i32
    %c15_i32_93 = arith.constant 15 : i32
    %336 = arith.subi %c15_i32_93, %c9_i32 : i32
    %337 = arith.index_cast %c9_i32 : i32 to index
    %c0_94 = arith.constant 0 : index
    %338 = vector.load %arg9[%337, %c0_94] : memref<16x128xf32, #tpu.memory_space<vmem>>, vector<1x128xf32>
    %339 = arith.index_cast %336 : i32 to index
    %c0_95 = arith.constant 0 : index
    %340 = vector.load %arg9[%339, %c0_95] : memref<16x128xf32, #tpu.memory_space<vmem>>, vector<1x128xf32>
    %341 = arith.select %30, %338, %340 : vector<1x128xi1>, vector<1x128xf32>
    %342 = arith.truncf %329 : vector<1x32xf32> to vector<1x32xbf16>
    %cst_96 = arith.constant dense<0.000000e+00> : vector<1x128xf32>
    %343 = tpu.matmul %342, %36, %cst_96 {dimension_numbers = #tpu.dot_dimension_numbers<[1], [0], [0], [1], [0, 0, 1, 1], [], []>} : vector<1x32xbf16>, vector<32x128xbf16>, vector<1x128xf32> -> vector<1x128xf32>
    %344 = arith.addf %341, %343 : vector<1x128xf32>
    %cst_97 = arith.constant 5.000000e-01 : f32
    %345 = vector.broadcast %cst_97 : f32 to vector<1x128xf32>
    %346 = arith.mulf %345, %344 : vector<1x128xf32>
    %347 = arith.select %35, %344, %346 : vector<1x128xi1>, vector<1x128xf32>
    %348 = math.tanh %347 : vector<1x128xf32>
    %cst_98 = arith.constant 5.000000e-01 : f32
    %349 = vector.broadcast %cst_98 : f32 to vector<1x128xf32>
    %350 = arith.mulf %349, %348 : vector<1x128xf32>
    %cst_99 = arith.constant 5.000000e-01 : f32
    %351 = vector.broadcast %cst_99 : f32 to vector<1x128xf32>
    %352 = arith.addf %350, %351 : vector<1x128xf32>
    %353 = arith.select %35, %348, %352 : vector<1x128xi1>, vector<1x128xf32>
    %354 = vector.extract_strided_slice %353 {offsets = [0, 0], sizes = [1, 32], strides = [1, 1]} : vector<1x128xf32> to vector<1x32xf32>
    %355 = vector.extract_strided_slice %353 {offsets = [0, 32], sizes = [1, 32], strides = [1, 1]} : vector<1x128xf32> to vector<1x32xf32>
    %356 = vector.extract_strided_slice %353 {offsets = [0, 64], sizes = [1, 32], strides = [1, 1]} : vector<1x128xf32> to vector<1x32xf32>
    %357 = vector.extract_strided_slice %353 {offsets = [0, 96], sizes = [1, 32], strides = [1, 1]} : vector<1x128xf32> to vector<1x32xf32>
    %358 = arith.mulf %355, %327 : vector<1x32xf32>
    %359 = arith.mulf %354, %356 : vector<1x32xf32>
    %360 = arith.addf %358, %359 : vector<1x32xf32>
    %361 = math.tanh %360 : vector<1x32xf32>
    %362 = arith.mulf %357, %361 : vector<1x32xf32>
    %363 = vector.extract_strided_slice %362 {offsets = [0, 0], sizes = [1, 16], strides = [1, 1]} : vector<1x32xf32> to vector<1x16xf32>
    %364 = arith.index_cast %c9_i32 : i32 to index
    %c0_100 = arith.constant 0 : index
    %365 = vector.load %arg5[%364, %c0_100] : memref<16x32xf32, #tpu.memory_space<vmem>>, vector<1x16xf32>
    tpu.vector_store %arg5[%364, %c0_100], %363 {strides = array<i32>} : memref<16x32xf32, #tpu.memory_space<vmem>>, vector<1x16xf32>,
    %366 = vector.extract_strided_slice %362 {offsets = [0, 16], sizes = [1, 16], strides = [1, 1]} : vector<1x32xf32> to vector<1x16xf32>
    %367 = arith.index_cast %336 : i32 to index
    %c16_101 = arith.constant 16 : index
    %368 = vector.load %arg5[%367, %c16_101] : memref<16x32xf32, #tpu.memory_space<vmem>>, vector<1x16xf32>
    tpu.vector_store %arg5[%367, %c16_101], %366 {strides = array<i32>} : memref<16x32xf32, #tpu.memory_space<vmem>>, vector<1x16xf32>,
    %c10_i32 = arith.constant 10 : i32
    %c15_i32_102 = arith.constant 15 : i32
    %369 = arith.subi %c15_i32_102, %c10_i32 : i32
    %370 = arith.index_cast %c10_i32 : i32 to index
    %c0_103 = arith.constant 0 : index
    %371 = vector.load %arg9[%370, %c0_103] : memref<16x128xf32, #tpu.memory_space<vmem>>, vector<1x128xf32>
    %372 = arith.index_cast %369 : i32 to index
    %c0_104 = arith.constant 0 : index
    %373 = vector.load %arg9[%372, %c0_104] : memref<16x128xf32, #tpu.memory_space<vmem>>, vector<1x128xf32>
    %374 = arith.select %30, %371, %373 : vector<1x128xi1>, vector<1x128xf32>
    %375 = arith.truncf %362 : vector<1x32xf32> to vector<1x32xbf16>
    %cst_105 = arith.constant dense<0.000000e+00> : vector<1x128xf32>
    %376 = tpu.matmul %375, %36, %cst_105 {dimension_numbers = #tpu.dot_dimension_numbers<[1], [0], [0], [1], [0, 0, 1, 1], [], []>} : vector<1x32xbf16>, vector<32x128xbf16>, vector<1x128xf32> -> vector<1x128xf32>
    %377 = arith.addf %374, %376 : vector<1x128xf32>
    %cst_106 = arith.constant 5.000000e-01 : f32
    %378 = vector.broadcast %cst_106 : f32 to vector<1x128xf32>
    %379 = arith.mulf %378, %377 : vector<1x128xf32>
    %380 = arith.select %35, %377, %379 : vector<1x128xi1>, vector<1x128xf32>
    %381 = math.tanh %380 : vector<1x128xf32>
    %cst_107 = arith.constant 5.000000e-01 : f32
    %382 = vector.broadcast %cst_107 : f32 to vector<1x128xf32>
    %383 = arith.mulf %382, %381 : vector<1x128xf32>
    %cst_108 = arith.constant 5.000000e-01 : f32
    %384 = vector.broadcast %cst_108 : f32 to vector<1x128xf32>
    %385 = arith.addf %383, %384 : vector<1x128xf32>
    %386 = arith.select %35, %381, %385 : vector<1x128xi1>, vector<1x128xf32>
    %387 = vector.extract_strided_slice %386 {offsets = [0, 0], sizes = [1, 32], strides = [1, 1]} : vector<1x128xf32> to vector<1x32xf32>
    %388 = vector.extract_strided_slice %386 {offsets = [0, 32], sizes = [1, 32], strides = [1, 1]} : vector<1x128xf32> to vector<1x32xf32>
    %389 = vector.extract_strided_slice %386 {offsets = [0, 64], sizes = [1, 32], strides = [1, 1]} : vector<1x128xf32> to vector<1x32xf32>
    %390 = vector.extract_strided_slice %386 {offsets = [0, 96], sizes = [1, 32], strides = [1, 1]} : vector<1x128xf32> to vector<1x32xf32>
    %391 = arith.mulf %388, %360 : vector<1x32xf32>
    %392 = arith.mulf %387, %389 : vector<1x32xf32>
    %393 = arith.addf %391, %392 : vector<1x32xf32>
    %394 = math.tanh %393 : vector<1x32xf32>
    %395 = arith.mulf %390, %394 : vector<1x32xf32>
    %396 = vector.extract_strided_slice %395 {offsets = [0, 0], sizes = [1, 16], strides = [1, 1]} : vector<1x32xf32> to vector<1x16xf32>
    %397 = arith.index_cast %c10_i32 : i32 to index
    %c0_109 = arith.constant 0 : index
    %398 = vector.load %arg5[%397, %c0_109] : memref<16x32xf32, #tpu.memory_space<vmem>>, vector<1x16xf32>
    tpu.vector_store %arg5[%397, %c0_109], %396 {strides = array<i32>} : memref<16x32xf32, #tpu.memory_space<vmem>>, vector<1x16xf32>,
    %399 = vector.extract_strided_slice %395 {offsets = [0, 16], sizes = [1, 16], strides = [1, 1]} : vector<1x32xf32> to vector<1x16xf32>
    %400 = arith.index_cast %369 : i32 to index
    %c16_110 = arith.constant 16 : index
    %401 = vector.load %arg5[%400, %c16_110] : memref<16x32xf32, #tpu.memory_space<vmem>>, vector<1x16xf32>
    tpu.vector_store %arg5[%400, %c16_110], %399 {strides = array<i32>} : memref<16x32xf32, #tpu.memory_space<vmem>>, vector<1x16xf32>,
    %c11_i32 = arith.constant 11 : i32
    %c15_i32_111 = arith.constant 15 : i32
    %402 = arith.subi %c15_i32_111, %c11_i32 : i32
    %403 = arith.index_cast %c11_i32 : i32 to index
    %c0_112 = arith.constant 0 : index
    %404 = vector.load %arg9[%403, %c0_112] : memref<16x128xf32, #tpu.memory_space<vmem>>, vector<1x128xf32>
    %405 = arith.index_cast %402 : i32 to index
    %c0_113 = arith.constant 0 : index
    %406 = vector.load %arg9[%405, %c0_113] : memref<16x128xf32, #tpu.memory_space<vmem>>, vector<1x128xf32>
    %407 = arith.select %30, %404, %406 : vector<1x128xi1>, vector<1x128xf32>
    %408 = arith.truncf %395 : vector<1x32xf32> to vector<1x32xbf16>
    %cst_114 = arith.constant dense<0.000000e+00> : vector<1x128xf32>
    %409 = tpu.matmul %408, %36, %cst_114 {dimension_numbers = #tpu.dot_dimension_numbers<[1], [0], [0], [1], [0, 0, 1, 1], [], []>} : vector<1x32xbf16>, vector<32x128xbf16>, vector<1x128xf32> -> vector<1x128xf32>
    %410 = arith.addf %407, %409 : vector<1x128xf32>
    %cst_115 = arith.constant 5.000000e-01 : f32
    %411 = vector.broadcast %cst_115 : f32 to vector<1x128xf32>
    %412 = arith.mulf %411, %410 : vector<1x128xf32>
    %413 = arith.select %35, %410, %412 : vector<1x128xi1>, vector<1x128xf32>
    %414 = math.tanh %413 : vector<1x128xf32>
    %cst_116 = arith.constant 5.000000e-01 : f32
    %415 = vector.broadcast %cst_116 : f32 to vector<1x128xf32>
    %416 = arith.mulf %415, %414 : vector<1x128xf32>
    %cst_117 = arith.constant 5.000000e-01 : f32
    %417 = vector.broadcast %cst_117 : f32 to vector<1x128xf32>
    %418 = arith.addf %416, %417 : vector<1x128xf32>
    %419 = arith.select %35, %414, %418 : vector<1x128xi1>, vector<1x128xf32>
    %420 = vector.extract_strided_slice %419 {offsets = [0, 0], sizes = [1, 32], strides = [1, 1]} : vector<1x128xf32> to vector<1x32xf32>
    %421 = vector.extract_strided_slice %419 {offsets = [0, 32], sizes = [1, 32], strides = [1, 1]} : vector<1x128xf32> to vector<1x32xf32>
    %422 = vector.extract_strided_slice %419 {offsets = [0, 64], sizes = [1, 32], strides = [1, 1]} : vector<1x128xf32> to vector<1x32xf32>
    %423 = vector.extract_strided_slice %419 {offsets = [0, 96], sizes = [1, 32], strides = [1, 1]} : vector<1x128xf32> to vector<1x32xf32>
    %424 = arith.mulf %421, %393 : vector<1x32xf32>
    %425 = arith.mulf %420, %422 : vector<1x32xf32>
    %426 = arith.addf %424, %425 : vector<1x32xf32>
    %427 = math.tanh %426 : vector<1x32xf32>
    %428 = arith.mulf %423, %427 : vector<1x32xf32>
    %429 = vector.extract_strided_slice %428 {offsets = [0, 0], sizes = [1, 16], strides = [1, 1]} : vector<1x32xf32> to vector<1x16xf32>
    %430 = arith.index_cast %c11_i32 : i32 to index
    %c0_118 = arith.constant 0 : index
    %431 = vector.load %arg5[%430, %c0_118] : memref<16x32xf32, #tpu.memory_space<vmem>>, vector<1x16xf32>
    tpu.vector_store %arg5[%430, %c0_118], %429 {strides = array<i32>} : memref<16x32xf32, #tpu.memory_space<vmem>>, vector<1x16xf32>,
    %432 = vector.extract_strided_slice %428 {offsets = [0, 16], sizes = [1, 16], strides = [1, 1]} : vector<1x32xf32> to vector<1x16xf32>
    %433 = arith.index_cast %402 : i32 to index
    %c16_119 = arith.constant 16 : index
    %434 = vector.load %arg5[%433, %c16_119] : memref<16x32xf32, #tpu.memory_space<vmem>>, vector<1x16xf32>
    tpu.vector_store %arg5[%433, %c16_119], %432 {strides = array<i32>} : memref<16x32xf32, #tpu.memory_space<vmem>>, vector<1x16xf32>,
    %c12_i32 = arith.constant 12 : i32
    %c15_i32_120 = arith.constant 15 : i32
    %435 = arith.subi %c15_i32_120, %c12_i32 : i32
    %436 = arith.index_cast %c12_i32 : i32 to index
    %c0_121 = arith.constant 0 : index
    %437 = vector.load %arg9[%436, %c0_121] : memref<16x128xf32, #tpu.memory_space<vmem>>, vector<1x128xf32>
    %438 = arith.index_cast %435 : i32 to index
    %c0_122 = arith.constant 0 : index
    %439 = vector.load %arg9[%438, %c0_122] : memref<16x128xf32, #tpu.memory_space<vmem>>, vector<1x128xf32>
    %440 = arith.select %30, %437, %439 : vector<1x128xi1>, vector<1x128xf32>
    %441 = arith.truncf %428 : vector<1x32xf32> to vector<1x32xbf16>
    %cst_123 = arith.constant dense<0.000000e+00> : vector<1x128xf32>
    %442 = tpu.matmul %441, %36, %cst_123 {dimension_numbers = #tpu.dot_dimension_numbers<[1], [0], [0], [1], [0, 0, 1, 1], [], []>} : vector<1x32xbf16>, vector<32x128xbf16>, vector<1x128xf32> -> vector<1x128xf32>
    %443 = arith.addf %440, %442 : vector<1x128xf32>
    %cst_124 = arith.constant 5.000000e-01 : f32
    %444 = vector.broadcast %cst_124 : f32 to vector<1x128xf32>
    %445 = arith.mulf %444, %443 : vector<1x128xf32>
    %446 = arith.select %35, %443, %445 : vector<1x128xi1>, vector<1x128xf32>
    %447 = math.tanh %446 : vector<1x128xf32>
    %cst_125 = arith.constant 5.000000e-01 : f32
    %448 = vector.broadcast %cst_125 : f32 to vector<1x128xf32>
    %449 = arith.mulf %448, %447 : vector<1x128xf32>
    %cst_126 = arith.constant 5.000000e-01 : f32
    %450 = vector.broadcast %cst_126 : f32 to vector<1x128xf32>
    %451 = arith.addf %449, %450 : vector<1x128xf32>
    %452 = arith.select %35, %447, %451 : vector<1x128xi1>, vector<1x128xf32>
    %453 = vector.extract_strided_slice %452 {offsets = [0, 0], sizes = [1, 32], strides = [1, 1]} : vector<1x128xf32> to vector<1x32xf32>
    %454 = vector.extract_strided_slice %452 {offsets = [0, 32], sizes = [1, 32], strides = [1, 1]} : vector<1x128xf32> to vector<1x32xf32>
    %455 = vector.extract_strided_slice %452 {offsets = [0, 64], sizes = [1, 32], strides = [1, 1]} : vector<1x128xf32> to vector<1x32xf32>
    %456 = vector.extract_strided_slice %452 {offsets = [0, 96], sizes = [1, 32], strides = [1, 1]} : vector<1x128xf32> to vector<1x32xf32>
    %457 = arith.mulf %454, %426 : vector<1x32xf32>
    %458 = arith.mulf %453, %455 : vector<1x32xf32>
    %459 = arith.addf %457, %458 : vector<1x32xf32>
    %460 = math.tanh %459 : vector<1x32xf32>
    %461 = arith.mulf %456, %460 : vector<1x32xf32>
    %462 = vector.extract_strided_slice %461 {offsets = [0, 0], sizes = [1, 16], strides = [1, 1]} : vector<1x32xf32> to vector<1x16xf32>
    %463 = arith.index_cast %c12_i32 : i32 to index
    %c0_127 = arith.constant 0 : index
    %464 = vector.load %arg5[%463, %c0_127] : memref<16x32xf32, #tpu.memory_space<vmem>>, vector<1x16xf32>
    tpu.vector_store %arg5[%463, %c0_127], %462 {strides = array<i32>} : memref<16x32xf32, #tpu.memory_space<vmem>>, vector<1x16xf32>,
    %465 = vector.extract_strided_slice %461 {offsets = [0, 16], sizes = [1, 16], strides = [1, 1]} : vector<1x32xf32> to vector<1x16xf32>
    %466 = arith.index_cast %435 : i32 to index
    %c16_128 = arith.constant 16 : index
    %467 = vector.load %arg5[%466, %c16_128] : memref<16x32xf32, #tpu.memory_space<vmem>>, vector<1x16xf32>
    tpu.vector_store %arg5[%466, %c16_128], %465 {strides = array<i32>} : memref<16x32xf32, #tpu.memory_space<vmem>>, vector<1x16xf32>,
    %c13_i32 = arith.constant 13 : i32
    %c15_i32_129 = arith.constant 15 : i32
    %468 = arith.subi %c15_i32_129, %c13_i32 : i32
    %469 = arith.index_cast %c13_i32 : i32 to index
    %c0_130 = arith.constant 0 : index
    %470 = vector.load %arg9[%469, %c0_130] : memref<16x128xf32, #tpu.memory_space<vmem>>, vector<1x128xf32>
    %471 = arith.index_cast %468 : i32 to index
    %c0_131 = arith.constant 0 : index
    %472 = vector.load %arg9[%471, %c0_131] : memref<16x128xf32, #tpu.memory_space<vmem>>, vector<1x128xf32>
    %473 = arith.select %30, %470, %472 : vector<1x128xi1>, vector<1x128xf32>
    %474 = arith.truncf %461 : vector<1x32xf32> to vector<1x32xbf16>
    %cst_132 = arith.constant dense<0.000000e+00> : vector<1x128xf32>
    %475 = tpu.matmul %474, %36, %cst_132 {dimension_numbers = #tpu.dot_dimension_numbers<[1], [0], [0], [1], [0, 0, 1, 1], [], []>} : vector<1x32xbf16>, vector<32x128xbf16>, vector<1x128xf32> -> vector<1x128xf32>
    %476 = arith.addf %473, %475 : vector<1x128xf32>
    %cst_133 = arith.constant 5.000000e-01 : f32
    %477 = vector.broadcast %cst_133 : f32 to vector<1x128xf32>
    %478 = arith.mulf %477, %476 : vector<1x128xf32>
    %479 = arith.select %35, %476, %478 : vector<1x128xi1>, vector<1x128xf32>
    %480 = math.tanh %479 : vector<1x128xf32>
    %cst_134 = arith.constant 5.000000e-01 : f32
    %481 = vector.broadcast %cst_134 : f32 to vector<1x128xf32>
    %482 = arith.mulf %481, %480 : vector<1x128xf32>
    %cst_135 = arith.constant 5.000000e-01 : f32
    %483 = vector.broadcast %cst_135 : f32 to vector<1x128xf32>
    %484 = arith.addf %482, %483 : vector<1x128xf32>
    %485 = arith.select %35, %480, %484 : vector<1x128xi1>, vector<1x128xf32>
    %486 = vector.extract_strided_slice %485 {offsets = [0, 0], sizes = [1, 32], strides = [1, 1]} : vector<1x128xf32> to vector<1x32xf32>
    %487 = vector.extract_strided_slice %485 {offsets = [0, 32], sizes = [1, 32], strides = [1, 1]} : vector<1x128xf32> to vector<1x32xf32>
    %488 = vector.extract_strided_slice %485 {offsets = [0, 64], sizes = [1, 32], strides = [1, 1]} : vector<1x128xf32> to vector<1x32xf32>
    %489 = vector.extract_strided_slice %485 {offsets = [0, 96], sizes = [1, 32], strides = [1, 1]} : vector<1x128xf32> to vector<1x32xf32>
    %490 = arith.mulf %487, %459 : vector<1x32xf32>
    %491 = arith.mulf %486, %488 : vector<1x32xf32>
    %492 = arith.addf %490, %491 : vector<1x32xf32>
    %493 = math.tanh %492 : vector<1x32xf32>
    %494 = arith.mulf %489, %493 : vector<1x32xf32>
    %495 = vector.extract_strided_slice %494 {offsets = [0, 0], sizes = [1, 16], strides = [1, 1]} : vector<1x32xf32> to vector<1x16xf32>
    %496 = arith.index_cast %c13_i32 : i32 to index
    %c0_136 = arith.constant 0 : index
    %497 = vector.load %arg5[%496, %c0_136] : memref<16x32xf32, #tpu.memory_space<vmem>>, vector<1x16xf32>
    tpu.vector_store %arg5[%496, %c0_136], %495 {strides = array<i32>} : memref<16x32xf32, #tpu.memory_space<vmem>>, vector<1x16xf32>,
    %498 = vector.extract_strided_slice %494 {offsets = [0, 16], sizes = [1, 16], strides = [1, 1]} : vector<1x32xf32> to vector<1x16xf32>
    %499 = arith.index_cast %468 : i32 to index
    %c16_137 = arith.constant 16 : index
    %500 = vector.load %arg5[%499, %c16_137] : memref<16x32xf32, #tpu.memory_space<vmem>>, vector<1x16xf32>
    tpu.vector_store %arg5[%499, %c16_137], %498 {strides = array<i32>} : memref<16x32xf32, #tpu.memory_space<vmem>>, vector<1x16xf32>,
    %c14_i32 = arith.constant 14 : i32
    %c15_i32_138 = arith.constant 15 : i32
    %501 = arith.subi %c15_i32_138, %c14_i32 : i32
    %502 = arith.index_cast %c14_i32 : i32 to index
    %c0_139 = arith.constant 0 : index
    %503 = vector.load %arg9[%502, %c0_139] : memref<16x128xf32, #tpu.memory_space<vmem>>, vector<1x128xf32>
    %504 = arith.index_cast %501 : i32 to index
    %c0_140 = arith.constant 0 : index
    %505 = vector.load %arg9[%504, %c0_140] : memref<16x128xf32, #tpu.memory_space<vmem>>, vector<1x128xf32>
    %506 = arith.select %30, %503, %505 : vector<1x128xi1>, vector<1x128xf32>
    %507 = arith.truncf %494 : vector<1x32xf32> to vector<1x32xbf16>
    %cst_141 = arith.constant dense<0.000000e+00> : vector<1x128xf32>
    %508 = tpu.matmul %507, %36, %cst_141 {dimension_numbers = #tpu.dot_dimension_numbers<[1], [0], [0], [1], [0, 0, 1, 1], [], []>} : vector<1x32xbf16>, vector<32x128xbf16>, vector<1x128xf32> -> vector<1x128xf32>
    %509 = arith.addf %506, %508 : vector<1x128xf32>
    %cst_142 = arith.constant 5.000000e-01 : f32
    %510 = vector.broadcast %cst_142 : f32 to vector<1x128xf32>
    %511 = arith.mulf %510, %509 : vector<1x128xf32>
    %512 = arith.select %35, %509, %511 : vector<1x128xi1>, vector<1x128xf32>
    %513 = math.tanh %512 : vector<1x128xf32>
    %cst_143 = arith.constant 5.000000e-01 : f32
    %514 = vector.broadcast %cst_143 : f32 to vector<1x128xf32>
    %515 = arith.mulf %514, %513 : vector<1x128xf32>
    %cst_144 = arith.constant 5.000000e-01 : f32
    %516 = vector.broadcast %cst_144 : f32 to vector<1x128xf32>
    %517 = arith.addf %515, %516 : vector<1x128xf32>
    %518 = arith.select %35, %513, %517 : vector<1x128xi1>, vector<1x128xf32>
    %519 = vector.extract_strided_slice %518 {offsets = [0, 0], sizes = [1, 32], strides = [1, 1]} : vector<1x128xf32> to vector<1x32xf32>
    %520 = vector.extract_strided_slice %518 {offsets = [0, 32], sizes = [1, 32], strides = [1, 1]} : vector<1x128xf32> to vector<1x32xf32>
    %521 = vector.extract_strided_slice %518 {offsets = [0, 64], sizes = [1, 32], strides = [1, 1]} : vector<1x128xf32> to vector<1x32xf32>
    %522 = vector.extract_strided_slice %518 {offsets = [0, 96], sizes = [1, 32], strides = [1, 1]} : vector<1x128xf32> to vector<1x32xf32>
    %523 = arith.mulf %520, %492 : vector<1x32xf32>
    %524 = arith.mulf %519, %521 : vector<1x32xf32>
    %525 = arith.addf %523, %524 : vector<1x32xf32>
    %526 = math.tanh %525 : vector<1x32xf32>
    %527 = arith.mulf %522, %526 : vector<1x32xf32>
    %528 = vector.extract_strided_slice %527 {offsets = [0, 0], sizes = [1, 16], strides = [1, 1]} : vector<1x32xf32> to vector<1x16xf32>
    %529 = arith.index_cast %c14_i32 : i32 to index
    %c0_145 = arith.constant 0 : index
    %530 = vector.load %arg5[%529, %c0_145] : memref<16x32xf32, #tpu.memory_space<vmem>>, vector<1x16xf32>
    tpu.vector_store %arg5[%529, %c0_145], %528 {strides = array<i32>} : memref<16x32xf32, #tpu.memory_space<vmem>>, vector<1x16xf32>,
    %531 = vector.extract_strided_slice %527 {offsets = [0, 16], sizes = [1, 16], strides = [1, 1]} : vector<1x32xf32> to vector<1x16xf32>
    %532 = arith.index_cast %501 : i32 to index
    %c16_146 = arith.constant 16 : index
    %533 = vector.load %arg5[%532, %c16_146] : memref<16x32xf32, #tpu.memory_space<vmem>>, vector<1x16xf32>
    tpu.vector_store %arg5[%532, %c16_146], %531 {strides = array<i32>} : memref<16x32xf32, #tpu.memory_space<vmem>>, vector<1x16xf32>,
    %c15_i32_147 = arith.constant 15 : i32
    %c15_i32_148 = arith.constant 15 : i32
    %534 = arith.subi %c15_i32_148, %c15_i32_147 : i32
    %535 = arith.index_cast %c15_i32_147 : i32 to index
    %c0_149 = arith.constant 0 : index
    %536 = vector.load %arg9[%535, %c0_149] : memref<16x128xf32, #tpu.memory_space<vmem>>, vector<1x128xf32>
    %537 = arith.index_cast %534 : i32 to index
    %c0_150 = arith.constant 0 : index
    %538 = vector.load %arg9[%537, %c0_150] : memref<16x128xf32, #tpu.memory_space<vmem>>, vector<1x128xf32>
    %539 = arith.select %30, %536, %538 : vector<1x128xi1>, vector<1x128xf32>
    %540 = arith.truncf %527 : vector<1x32xf32> to vector<1x32xbf16>
    %cst_151 = arith.constant dense<0.000000e+00> : vector<1x128xf32>
    %541 = tpu.matmul %540, %36, %cst_151 {dimension_numbers = #tpu.dot_dimension_numbers<[1], [0], [0], [1], [0, 0, 1, 1], [], []>} : vector<1x32xbf16>, vector<32x128xbf16>, vector<1x128xf32> -> vector<1x128xf32>
    %542 = arith.addf %539, %541 : vector<1x128xf32>
    %cst_152 = arith.constant 5.000000e-01 : f32
    %543 = vector.broadcast %cst_152 : f32 to vector<1x128xf32>
    %544 = arith.mulf %543, %542 : vector<1x128xf32>
    %545 = arith.select %35, %542, %544 : vector<1x128xi1>, vector<1x128xf32>
    %546 = math.tanh %545 : vector<1x128xf32>
    %cst_153 = arith.constant 5.000000e-01 : f32
    %547 = vector.broadcast %cst_153 : f32 to vector<1x128xf32>
    %548 = arith.mulf %547, %546 : vector<1x128xf32>
    %cst_154 = arith.constant 5.000000e-01 : f32
    %549 = vector.broadcast %cst_154 : f32 to vector<1x128xf32>
    %550 = arith.addf %548, %549 : vector<1x128xf32>
    %551 = arith.select %35, %546, %550 : vector<1x128xi1>, vector<1x128xf32>
    %552 = vector.extract_strided_slice %551 {offsets = [0, 0], sizes = [1, 32], strides = [1, 1]} : vector<1x128xf32> to vector<1x32xf32>
    %553 = vector.extract_strided_slice %551 {offsets = [0, 32], sizes = [1, 32], strides = [1, 1]} : vector<1x128xf32> to vector<1x32xf32>
    %554 = vector.extract_strided_slice %551 {offsets = [0, 64], sizes = [1, 32], strides = [1, 1]} : vector<1x128xf32> to vector<1x32xf32>
    %555 = vector.extract_strided_slice %551 {offsets = [0, 96], sizes = [1, 32], strides = [1, 1]} : vector<1x128xf32> to vector<1x32xf32>
    %556 = arith.mulf %553, %525 : vector<1x32xf32>
    %557 = arith.mulf %552, %554 : vector<1x32xf32>
    %558 = arith.addf %556, %557 : vector<1x32xf32>
    %559 = math.tanh %558 : vector<1x32xf32>
    %560 = arith.mulf %555, %559 : vector<1x32xf32>
    %561 = vector.extract_strided_slice %560 {offsets = [0, 0], sizes = [1, 16], strides = [1, 1]} : vector<1x32xf32> to vector<1x16xf32>
    %562 = arith.index_cast %c15_i32_147 : i32 to index
    %c0_155 = arith.constant 0 : index
    %563 = vector.load %arg5[%562, %c0_155] : memref<16x32xf32, #tpu.memory_space<vmem>>, vector<1x16xf32>
    tpu.vector_store %arg5[%562, %c0_155], %561 {strides = array<i32>} : memref<16x32xf32, #tpu.memory_space<vmem>>, vector<1x16xf32>,
    %564 = vector.extract_strided_slice %560 {offsets = [0, 16], sizes = [1, 16], strides = [1, 1]} : vector<1x32xf32> to vector<1x16xf32>
    %565 = arith.index_cast %534 : i32 to index
    %c16_156 = arith.constant 16 : index
    %566 = vector.load %arg5[%565, %c16_156] : memref<16x32xf32, #tpu.memory_space<vmem>>, vector<1x16xf32>
    tpu.vector_store %arg5[%565, %c16_156], %564 {strides = array<i32>} : memref<16x32xf32, #tpu.memory_space<vmem>>, vector<1x16xf32>,
    %c16_i32_157 = arith.constant 16 : i32
    %567 = vector.extract_strided_slice %560 {offsets = [0, 0], sizes = [1, 16], strides = [1, 1]} : vector<1x32xf32> to vector<1x16xf32>
    %c0_158 = arith.constant 0 : index
    %c0_159 = arith.constant 0 : index
    %568 = vector.load %arg7[%c0_158, %c0_159] : memref<2x16xf32, #tpu.memory_space<vmem>>, vector<1x16xf32>
    tpu.vector_store %arg7[%c0_158, %c0_159], %567 {strides = array<i32>} : memref<2x16xf32, #tpu.memory_space<vmem>>, vector<1x16xf32>,
    %569 = vector.extract_strided_slice %560 {offsets = [0, 16], sizes = [1, 16], strides = [1, 1]} : vector<1x32xf32> to vector<1x16xf32>
    %c1 = arith.constant 1 : index
    %c0_160 = arith.constant 0 : index
    %570 = vector.load %arg7[%c1, %c0_160] : memref<2x16xf32, #tpu.memory_space<vmem>>, vector<1x16xf32>
    tpu.vector_store %arg7[%c1, %c0_160], %569 {strides = array<i32>} : memref<2x16xf32, #tpu.memory_space<vmem>>, vector<1x16xf32>,
    %571 = vector.extract_strided_slice %558 {offsets = [0, 0], sizes = [1, 16], strides = [1, 1]} : vector<1x32xf32> to vector<1x16xf32>
    %c0_161 = arith.constant 0 : index
    %c0_162 = arith.constant 0 : index
    %572 = vector.load %arg8[%c0_161, %c0_162] : memref<2x16xf32, #tpu.memory_space<vmem>>, vector<1x16xf32>
    tpu.vector_store %arg8[%c0_161, %c0_162], %571 {strides = array<i32>} : memref<2x16xf32, #tpu.memory_space<vmem>>, vector<1x16xf32>,
    %573 = vector.extract_strided_slice %558 {offsets = [0, 16], sizes = [1, 16], strides = [1, 1]} : vector<1x32xf32> to vector<1x16xf32>
    %c1_163 = arith.constant 1 : index
    %c0_164 = arith.constant 0 : index
    %574 = vector.load %arg8[%c1_163, %c0_164] : memref<2x16xf32, #tpu.memory_space<vmem>>, vector<1x16xf32>
    tpu.vector_store %arg8[%c1_163, %c0_164], %573 {strides = array<i32>} : memref<2x16xf32, #tpu.memory_space<vmem>>, vector<1x16xf32>,
    %c0_i32_165 = arith.constant 0 : i32
    %575 = arith.index_cast %c0_i32_165 : i32 to index
    %576 = memref.load %arg4[%575] : memref<4xi32, #tpu.memory_space<smem>>
    %c0_i32_166 = arith.constant 0 : i32
    %c15_i32_167 = arith.constant 15 : i32
    %577 = arith.maxsi %c0_i32_166, %576 : i32
    %578 = arith.minsi %c15_i32_167, %577 : i32
    %579 = arith.index_cast %578 : i32 to index
    %c0_168 = arith.constant 0 : index
    %580 = vector.load %arg5[%579, %c0_168] : memref<16x32xf32, #tpu.memory_space<vmem>>, vector<1x32xf32>
    %581 = arith.index_cast %c0_i32_165 : i32 to index
    %c0_169 = arith.constant 0 : index
    %582 = vector.load %arg6[%581, %c0_169] : memref<4x32xf32, #tpu.memory_space<vmem>>, vector<1x32xf32>
    tpu.vector_store %arg6[%581, %c0_169], %580 {strides = array<i32>} : memref<4x32xf32, #tpu.memory_space<vmem>>, vector<1x32xf32>,
    %c1_i32_170 = arith.constant 1 : i32
    %583 = arith.index_cast %c1_i32_170 : i32 to index
    %584 = memref.load %arg4[%583] : memref<4xi32, #tpu.memory_space<smem>>
    %c0_i32_171 = arith.constant 0 : i32
    %c15_i32_172 = arith.constant 15 : i32
    %585 = arith.maxsi %c0_i32_171, %584 : i32
    %586 = arith.minsi %c15_i32_172, %585 : i32
    %587 = arith.index_cast %586 : i32 to index
    %c0_173 = arith.constant 0 : index
    %588 = vector.load %arg5[%587, %c0_173] : memref<16x32xf32, #tpu.memory_space<vmem>>, vector<1x32xf32>
    %589 = arith.index_cast %c1_i32_170 : i32 to index
    %c0_174 = arith.constant 0 : index
    %590 = vector.load %arg6[%589, %c0_174] : memref<4x32xf32, #tpu.memory_space<vmem>>, vector<1x32xf32>
    tpu.vector_store %arg6[%589, %c0_174], %588 {strides = array<i32>} : memref<4x32xf32, #tpu.memory_space<vmem>>, vector<1x32xf32>,
    %c2_i32_175 = arith.constant 2 : i32
    %591 = arith.index_cast %c2_i32_175 : i32 to index
    %592 = memref.load %arg4[%591] : memref<4xi32, #tpu.memory_space<smem>>
    %c0_i32_176 = arith.constant 0 : i32
    %c15_i32_177 = arith.constant 15 : i32
    %593 = arith.maxsi %c0_i32_176, %592 : i32
    %594 = arith.minsi %c15_i32_177, %593 : i32
    %595 = arith.index_cast %594 : i32 to index
    %c0_178 = arith.constant 0 : index
    %596 = vector.load %arg5[%595, %c0_178] : memref<16x32xf32, #tpu.memory_space<vmem>>, vector<1x32xf32>
    %597 = arith.index_cast %c2_i32_175 : i32 to index
    %c0_179 = arith.constant 0 : index
    %598 = vector.load %arg6[%597, %c0_179] : memref<4x32xf32, #tpu.memory_space<vmem>>, vector<1x32xf32>
    tpu.vector_store %arg6[%597, %c0_179], %596 {strides = array<i32>} : memref<4x32xf32, #tpu.memory_space<vmem>>, vector<1x32xf32>,
    %c3_i32_180 = arith.constant 3 : i32
    %599 = arith.index_cast %c3_i32_180 : i32 to index
    %600 = memref.load %arg4[%599] : memref<4xi32, #tpu.memory_space<smem>>
    %c0_i32_181 = arith.constant 0 : i32
    %c15_i32_182 = arith.constant 15 : i32
    %601 = arith.maxsi %c0_i32_181, %600 : i32
    %602 = arith.minsi %c15_i32_182, %601 : i32
    %603 = arith.index_cast %602 : i32 to index
    %c0_183 = arith.constant 0 : index
    %604 = vector.load %arg5[%603, %c0_183] : memref<16x32xf32, #tpu.memory_space<vmem>>, vector<1x32xf32>
    %605 = arith.index_cast %c3_i32_180 : i32 to index
    %c0_184 = arith.constant 0 : index
    %606 = vector.load %arg6[%605, %c0_184] : memref<4x32xf32, #tpu.memory_space<vmem>>, vector<1x32xf32>
    tpu.vector_store %arg6[%605, %c0_184], %604 {strides = array<i32>} : memref<4x32xf32, #tpu.memory_space<vmem>>, vector<1x32xf32>,
    %c4_i32_185 = arith.constant 4 : i32
    return
  }
}

</mosaic_0001>

<bundles_post_ra>
// kernel: tpu_custom_call.1
= control target key start
LH: loop header
LB: loop body
LE: loop exit
PB: predicated region body
PF: predicated region fallthrough
CT: control target
= control target key end

     0   :  { %14 = vsyncpa [#allocation4], 0  ;;  %s2622_s0 = inlined_call_operand.hbm [shape: f32[16,32], index: 0, kind: input, shape index: {}]   ;;  %s2623_s1 = inlined_call_operand.hbm [shape: f32[32,128], index: 1, kind: input, shape index: {}]   ;;  %s2624_s2 = inlined_call_operand.hbm [shape: bf16[32,128], index: 2, kind: input, shape index: {}]   ;;  %s2625_s3 = inlined_call_operand.vmem [shape: f32[1,128], index: 3, kind: input, shape index: {}]   ;;  %s2626_s4 = inlined_call_operand.vmem [shape: s32[4], index: 4, kind: input, shape index: {}]   ;;  %s2627_s5 = inlined_call_operand.hbm [shape: f32[16,32], index: 5, kind: output, shape index: {0}]   ;;  %s2628_s6 = inlined_call_operand.hbm [shape: f32[4,32], index: 6, kind: output, shape index: {1}]   ;;  %s2629_s7 = inlined_call_operand.hbm [shape: f32[2,16], index: 7, kind: output, shape index: {2}]   ;;  %s2630_s8 = inlined_call_operand.hbm [shape: f32[2,16], index: 8, kind: output, shape index: {3}]  }
   0x1   :  { %15 = vsyncpa [#allocation8], 0 }
   0x2   :  { %16 = vsyncpa [#allocation6], 0 }
   0x3   :  { %17 = vsyncpa [#allocation5], 0 }
   0x4   :  { %18 = vsyncpa [#allocation13], 0 }
   0x5   :  { %19 = vsyncpa [#allocation16], 0  ;;  %s2098_s27 = smov [#allocation7]   ;;  %s2099_s29 = smov [#allocation3]  }
   0x6   :  { %s37_s28 = sshll.u32 %s2098_s27, 4  ;;  %s25_s30 = sshll.u32 %s2099_s29, 4  ;;  %s38_s28 = int_to_ptr.vmem [resolvable:$true] %s37_s28  ;;  %s26_s30 = int_to_ptr.vmem [resolvable:$true] %s25_s30 }
   0x7   :  { %s1942_s9 = scalar_lea.vmem %s38_s28, 512  ;;  %p1947_p1 = scmp.lt.s32.totalorder %s38_s28, %s38_s28 }
   0x8   :  { %p1943_p0 = scmp.ne.s32.totalorder %s38_s28, %s1942_s9  ;;  %p1948_p2 = scmp.lt.s32.totalorder %s1942_s9, %s1942_s9 }
   0xa   :  { %p1949_p3 = por %p1948_p2, %p1947_p1 }
   0xc   :  { %p1950_p4 = pnand %p1949_p3, %p1943_p0 }
   0xe   :  { %1953 = shalt.err (!%p1950_p4)
}
   0xf   :  { %s2100_s10 = smov 128   ;;  %s2101_s11 = smov 8  }
  0x10   :  { %43 = dma.hbm_to_vmem [thread:$0]  %s2623_s1, 512, %s38_s28, [#allocation8], %s2100_s10, %s2100_s10, %s2101_s11  }
  0x11   :  { %s1962_s14 = scalar_lea.vmem %s26_s30, 256  ;;  %p1967_p6 = scmp.lt.s32.totalorder %s26_s30, %s26_s30 }
  0x12   :  { %p1963_p5 = scmp.ne.s32.totalorder %s26_s30, %s1962_s14  ;;  %p1968_p7 = scmp.lt.s32.totalorder %s1962_s14, %s1962_s14 }
  0x14   :  { %p1969_p8 = por %p1968_p7, %p1967_p6 }
  0x16   :  { %p1970_p9 = pnand %p1969_p8, %p1963_p5 }
  0x18   :  { %1973 = shalt.err (!%p1970_p9)
}
  0x19   :  { %31 = dma.hbm_to_vmem [thread:$0]  %s2622_s0, 256, %s26_s30, [#allocation4], %s2100_s10, %s2100_s10, %s2101_s11  }
  0x1a   :  { %s2102_s17 = smov [#allocation9]   ;;  %s64_s1 = sshll.u32 %s2626_s4, 4  ;;  %s65_s1 = int_to_ptr.vmem [resolvable:$true] %s64_s1 }
  0x1b   :  { %s49_s18 = sshll.u32 %s2102_s17, 4  ;;  %s50_s18 = int_to_ptr.vmem [resolvable:$true] %s49_s18 }
  0x1c   :  { %s1982_s21 = scalar_lea.vmem %s50_s18, 256  ;;  %p1987_p11 = scmp.lt.s32.totalorder %s50_s18, %s50_s18 }
  0x1d   :  { %p1983_p10 = scmp.ne.s32.totalorder %s50_s18, %s1982_s21  ;;  %p1988_p12 = scmp.lt.s32.totalorder %s1982_s21, %s1982_s21 }
  0x1f   :  { %p1989_p13 = por %p1988_p12, %p1987_p11 }
  0x21   :  { %p1990_p0 = pnand %p1989_p13, %p1983_p10 }
  0x23   :  { %1993 = shalt.err (!%p1990_p0)
}
  0x24   :  { %s2103_s22 = smov 64   ;;  %s2104_s23 = smov 4  }
  0x25   :  { %55 = dma.hbm_to_vmem [thread:$0]  %s2624_s2, 256, %s50_s18, [#allocation8], %s2103_s22, %s2103_s22, %s2104_s23  }
  0x26   :  { %s1994_s25 = scalar_lea.vmem %s65_s1, 16  ;;  %p1999_p2 = scmp.lt.s32.totalorder %s65_s1, %s65_s1 }
  0x27   :  { %p1995_p1 = scmp.ne.s32.totalorder %s65_s1, %s1994_s25  ;;  %p2000_p3 = scmp.lt.s32.totalorder %s1994_s25, %s1994_s25 }
  0x29   :  { %p2001_p4 = por %p2000_p3, %p1999_p2 }
  0x2b   :  { %p2002_p5 = pnand %p2001_p4, %p1995_p1 }
  0x2d   :  { %2005 = shalt.err (!%p2002_p5)
}
  0x2e   :  { %s2105_s4 = smov [#allocation10]  }
  0x2f   :  { %67 = dma.vmem_to_smem %s65_s1, 16, %s2105_s4, [#allocation6]  }
  0x30   :  { %2086 = dma.done.wait [#allocation4], 256  }
  0x31   :  { %2087 = vsyncadd [#allocation4], 4294967040 }
  0x32   :  { %2088 = dma.done.wait [#allocation8], 768  }
  0x33   :  { %2089 = vsyncadd [#allocation8], 4294966528 }
  0x34   :  { %2090 = dma.done.wait [#allocation6], 16  }
  0x35   :  { %2091 = vsyncadd [#allocation6], 4294967280 }
  0x36   :  { %80 = sfence }
  0x37   :  { %v87_v0 = vld [vmem:[#allocation7 + $0x18] sm:$0xff]  ;;  %v86_v1 = vld [vmem:[#allocation7 + $0x10] sm:$0xff]  ;;  %vm95_vm0 = vcmask 261120   ;;  %v85_v2 = vld [vmem:[#allocation7 + $0x8] sm:$0xff]  ;;  %v2106_v4 = vmov 0.0   ;;  %vm2107_vm1 = vmmov 0   ;;  %v179_v10 = vlaneseq }
  0x38   :  { %1708 = vmatprep.subr.mxu0 %v87_v0  ;;  %v82_v3 = vld [vmem:[#allocation3] sm:$0xff]  ;;  %1719 = vmatprep.subr.bf16.mxu1 %v2106_v4  ;;  %v2184_v5 = vld [vmem:[#allocation9 + $0x8] sm:$0xff]   ;;  %v84_v6 = vld [vmem:[#allocation7] sm:$0xff]  ;;  %v2108_v9 = vmov 0   ;;  %s2110_s27 = smov 16   ;;  %s2111_s28 = smov 80  }
  0x39   :  { %1709 = vmatpush3.msra.mxu0 %v87_v0  ;;  %1716 = vmatprep.mubr.msk.f32.mxu0 %vm95_vm0, %v82_v3  ;;  %v2189_v7 = vld [vmem:[#allocation9] sm:$0xff]   ;;  %v83_v8 = vld [vmem:[#allocation3 + $0x8] sm:$0xff]  ;;  %v180_v11 = vand.u32 127, %v179_v10  ;;  %s2112_s29 = smov 96   ;;  %s1506_s30 = sld [smem:[#allocation10]] }
  0x3a   :  { %1710 = vmatprep.subr.mxu0 %v86_v1  ;;  %1723 = vmatprep.mubr.msk.bf16.mxu1 %vm2107_vm1, %v2106_v4  ;;  %v1603_v12 = vld [vmem:[%s2625_s3] ss:$0 sm:$0xff]  ;;  %s2109_s3 = smov 32   ;;  %s1628_s9 = sld [smem:[#allocation10 + $0x1]] }
  0x3b   :  { %1711 = vmatpush3.msra.mxu0 %v86_v1  ;;  %1720 = vmatpush3.bf16.msra.mxu1 %v2184_v5  ;;  %vm184_vm2 = vcmp.ge.s32.totalorder %v180_v11, 32  ;;  %vm185_vm3 = vcmp.lt.s32.totalorder %v180_v11, 48  ;;  %vm182_vm4 = vcmp.lt.s32.totalorder %v180_v11, 16  ;;  %vm188_vm6 = vcmp.ge.s32.totalorder %v180_v11, 64  ;;  %s1634_s12 = sld [smem:[#allocation10 + $0x2]]  ;;  %s2113_s14 = smov [#allocation11]  }
  0x3c   :  { %1712 = vmatprep.subr.mxu0 %v85_v2  ;;  %1721 = vmatprep.subr.bf16.mxu1 %v2106_v4  ;;  %vm186_vm5 = vmand %vm184_vm2, %vm185_vm3  ;;  %vm189_vm7 = vcmp.lt.s32.totalorder %v180_v11, 80  ;;  %vm192_vm10 = vcmp.ge.s32.totalorder %v180_v11, 96  ;;  %vm193_vm11 = vcmp.lt.s32.totalorder %v180_v11, 112  ;;  %vm196_vm15 = vcmp.lt.s32.totalorder %v180_v11, 96  ;;  %s1640_s13 = sld [smem:[#allocation10 + $0x3]]  ;;  %s1544_s15 = sshll.u32 %s2113_s14, 4  ;;  %s1545_s15 = int_to_ptr.vmem [resolvable:$true] %s1544_s15 }
  0x3d   :  { %1713 = vmatpush3.msra.mxu0 %v85_v2  ;;  %vm187_vm8 = vmor %vm182_vm4, %vm186_vm5  ;;  %s2114_s16 = smov [#allocation15]   ;;  %s2006_s18 = scalar_lea.vmem %s1545_s15, 256 }
  0x3e   :  { %1714 = vmatprep.subr.mxu0 %v84_v6  ;;  %vm190_vm9 = vmand %vm188_vm6, %vm189_vm7  ;;  %s1577_s17 = sshll.u32 %s2114_s16, 4  ;;  %p2007_p0 = scmp.ne.s32.totalorder %s1545_s15, %s2006_s18  ;;  %s1578_s17 = int_to_ptr.vmem [resolvable:$true] %s1577_s17 }
  0x3f   :  { %1715 = vmatpush3.msra.mxu0 %v84_v6  ;;  %1722 = vmatpush3.bf16.msra.mxu1 %v2189_v7  ;;  %vm191_vm12 = vmor %vm187_vm8, %vm190_vm9  ;;  %p1507_p6 = scmp.gt.s32.totalorder %s1506_s30, 0  ;;  %p1623_p7 = scmp.lt.s32.totalorder %s1506_s30, 15 }
  0x40   :  { %1717 = vmatmul.mubr.msk.f32.vlgmr.msra.gmra.mxu0 %vm95_vm0, %v83_v8  ;;  %1727 = vmatprep.subr.bf16.mxu0 %v2106_v4  ;;  %vm194_vm13 = vmand %vm192_vm10, %vm193_vm11  ;;  %p1516_p8 = scmp.gt.s32.totalorder %s1628_s9, 0  ;;  %p1629_p9 = scmp.lt.s32.totalorder %s1628_s9, 15 }
  0x41   :  { %1728 = vmatpush3.bf16.msra.mxu0 %v2184_v5  ;;  %1731 = vmatprep.mubr.msk.bf16.mxu0 %vm2107_vm1, %v2106_v4  ;;  %vm2212_vm14 = vmor %vm191_vm12, %vm194_vm13  ;;  %s2636_s30 = smov (!%p1507_p6, %s1506_s30), 0  ;;  %p1524_p10 = scmp.gt.s32.totalorder %s1634_s12, 0 }
  0x42   :  { %1724 = vmatmul.mubr.bf16.vlgmr.msra.gmra.mxu1 %v2108_v9  ;;  %1729 = vmatprep.subr.bf16.mxu0 %v2106_v4  ;;  %vm2219_vm2 = vmand %vm188_vm6, %vm196_vm15  ;;  %s2638_s9 = smov (!%p1516_p8, %s1628_s9), 0  ;;  %s2640_s30 = smov (!%p1623_p7, %s2636_s30), 15 }
  0x43   :  { %1735 = vmatprep.subr.bf16.mxu1 %v2106_v4  ;;  %1739 = vmatprep.mubr.msk.bf16.mxu1 %vm2107_vm1, %v2106_v4  ;;  %p1635_p11 = scmp.lt.s32.totalorder %s1634_s12, 15  ;;  %p1532_p12 = scmp.gt.s32.totalorder %s1640_s13, 0 }
  0x44   :  { %1736 = vmatpush3.bf16.msra.mxu1 %v2184_v5  ;;  %s2642_s12 = smov (!%p1524_p10, %s1634_s12), 0  ;;  %s2644_s9 = smov (!%p1629_p9, %s2638_s9), 15 }
  0x45   :  { %1730 = vmatpush3.bf16.msra.mxu0 %v2189_v7  ;;  %1737 = vmatprep.subr.bf16.mxu1 %v2106_v4  ;;  %p1641_p13 = scmp.lt.s32.totalorder %s1640_s13, 15  ;;  %s2646_s13 = smov (!%p1532_p12, %s1640_s13), 0 }
  0x46   :  { %1743 = vmatprep.subr.bf16.mxu0 %v2106_v4  ;;  %s2648_s12 = smov (!%p1635_p11, %s2642_s12), 15  ;;  %p2011_p1 = scmp.lt.s32.totalorder %s1545_s15, %s1545_s15 }
  0x47   :  { %s2650_s13 = smov (!%p1641_p13, %s2646_s13), 15  ;;  %p2012_p2 = scmp.lt.s32.totalorder %s2006_s18, %s2006_s18 }
  0x48   :  { %1738 = vmatpush3.bf16.msra.mxu1 %v2189_v7 }
  0x49   :  { %1751 = vmatprep.subr.bf16.mxu1 %v2106_v4  ;;  %p2013_p3 = por %p2012_p2, %p2011_p1 }
  0x4b   :  { %p2014_p4 = pnand %p2013_p3, %p2007_p0 }
 0x100   :  { %v1718_v13 = vpop.f32.mrf.mxu0 }
 0x101   :  { %v174_v14 = vadd.f32 %v1718_v13, %v1603_v12 }
 0x102   :  { %v168_v15 = vpop.f32.mrf.mxu0  ;;  %v254_v16 = vpop.f32.mrf.mxu1 }
 0x103   :  { %178 = vst [vmem:[#allocation2 + $0x8] sm:$0xff] %v174_v14  ;;  %v169_v17 = vadd.f32 %v1603_v12, %v168_v15 }
 0x104   :  { %v1725_v18 = vpop.f32.mrf.mxu1 }
 0x105   :  { %177 = vst [vmem:[#allocation2] sm:$0xff] %v169_v17 }
 0x106   :  { %v257_v19 = vpop.f32.mrf.mxu1 }
 0x108   :  { %v1726_v20 = vpop.f32.mrf.mxu1 }
 0x10a   :  { %v203_v23 = vld [vmem:[#allocation2 + $0xf] sm:$0x1]  ;;  %v293_v44 = vld [vmem:[#allocation2 + $0xe] sm:$0x1]  ;;  %v373_v6 = vld [vmem:[#allocation2 + $0xd] sm:$0x1] }
 0x10c   :  { %v202_v22 = vld [vmem:[#allocation2] sm:$0x1]  ;;  %v292_v43 = vld [vmem:[#allocation2 + $0x1] sm:$0x1]  ;;  %v372_v3 = vld [vmem:[#allocation2 + $0x2] sm:$0x1] }
 0x10d   :  { %v204_v24 = vsel %vm2212_vm14, %v202_v22, %v203_v23  ;;  %v294_v45 = vsel %vm2212_vm14, %v292_v43, %v293_v44  ;;  %v374_v8 = vsel %vm2212_vm14, %v372_v3, %v373_v6 }
 0x10e   :  { %v260_v25 = vadd.f32 %v254_v16, %v204_v24 }
 0x110   :  { %v261_v27 = vmul.f32 0.5, %v260_v25 }
 0x112   :  { %v262_v28 = vsel %vm2219_vm2, %v260_v25, %v261_v27 }
 0x113   :  { %1868 = vtanh.f32 %v262_v28 }
 0x120   :  { %v1869_v29 = vpop.eup %1868 }
 0x121   :  { %v264_v30 = vmul.f32 0.5, %v1869_v29 }
 0x123   :  { %v265_v31 = vadd.f32 0.5, %v264_v30 }
 0x125   :  { %v266_v32 = vsel %vm2219_vm2, %v1869_v29, %v265_v31 }
 0x126   :  { %269 = vrot.lane.b32.xlu0 %v266_v32, %s2103_s22  ;;  %v267_v35 = vmul.f32 0.0, %v266_v32 }
 0x198   :  { %v270_v33 = vpop.permute.xlu0 %269 }
 0x199   :  { %v272_v34 = vmul.f32 %v270_v33, %v266_v32  ;;  %v453_v33 = vld [vmem:[#allocation2 + $0xc] sm:$0x1] }
 0x19b   :  { %274 = vrot.lane.b32.xlu0 %v272_v34, %s2109_s3 }
 0x20d   :  { %v275_v36 = vpop.permute.xlu0 %274 }
 0x20e   :  { %v277_v37 = vadd.f32 %v275_v36, %v267_v35 }
 0x210   :  { %1870 = vtanh.f32 %v277_v37 }
 0x21d   :  { %v1871_v38 = vpop.eup %1870 }
 0x21e   :  { %280 = vrot.lane.b32.xlu1 %v1871_v38, %s2103_s22 }
 0x290   :  { %v281_v39 = vpop.permute.xlu1 %280 }
 0x291   :  { %v2230_v40 = vmul.f32 %v281_v39, %v266_v32  ;;  %v452_v32 = vld [vmem:[#allocation2 + $0x3] sm:$0x1] }
 0x292   :  { %v454_v34 = vsel %vm2212_vm14, %v452_v32, %v453_v33 }
 0x293   :  { %v295_v41 = vpack.c.bf16 %v2230_v40, %v2230_v40 }
 0x295   :  { %297 = vrot.lane.b32.xlu1 %v295_v41, %s2109_s3 }
 0x307   :  { %v298_v42 = vpop.permute.xlu1 %297 }
 0x308   :  { %1732 = vmatmul.mubr.msk.bf16.vlgmr.msra.gmra.mxu0 %vm95_vm0, %v298_v42 }
 0x309   :  { %1744 = vmatpush3.bf16.msra.mxu0 %v2184_v5  ;;  %1747 = vmatprep.mubr.msk.bf16.mxu0 %vm2107_vm1, %v2106_v4 }
 0x30a   :  { %1745 = vmatprep.subr.bf16.mxu0 %v2106_v4 }
 0x30d   :  { %1746 = vmatpush3.bf16.msra.mxu0 %v2189_v7 }
 0x30e   :  { %1759 = vmatprep.subr.bf16.mxu0 %v2106_v4 }
 0x3c8   :  { %v336_v46 = vpop.f32.mrf.mxu0 }
 0x3c9   :  { %v342_v47 = vadd.f32 %v336_v46, %v294_v45 }
 0x3ca   :  { %v1733_v48 = vpop.f32.mrf.mxu0 }
 0x3cb   :  { %v343_v49 = vmul.f32 0.5, %v342_v47 }
 0x3cc   :  { %v339_v50 = vpop.f32.mrf.mxu0 }
 0x3cd   :  { %v344_v51 = vsel %vm2219_vm2, %v342_v47, %v343_v49 }
 0x3ce   :  { %1872 = vtanh.f32 %v344_v51  ;;  %v1734_v52 = vpop.f32.mrf.mxu0 }
 0x3db   :  { %v1873_v53 = vpop.eup %1872 }
 0x3dc   :  { %v346_v54 = vmul.f32 0.5, %v1873_v53 }
 0x3de   :  { %v347_v55 = vadd.f32 0.5, %v346_v54 }
 0x3e0   :  { %v348_v56 = vsel %vm2219_vm2, %v1873_v53, %v347_v55 }
 0x3e1   :  { %351 = vrot.lane.b32.xlu0 %v348_v56, %s2103_s22  ;;  %v349_v59 = vmul.f32 %v348_v56, %v277_v37 }
 0x453   :  { %v352_v57 = vpop.permute.xlu0 %351 }
 0x454   :  { %v354_v58 = vmul.f32 %v352_v57, %v348_v56  ;;  %v532_v57 = vld [vmem:[#allocation2 + $0x4] sm:$0x1] }
 0x456   :  { %356 = vrot.lane.b32.xlu1 %v354_v58, %s2109_s3  ;;  %v533_v58 = vld [vmem:[#allocation2 + $0xb] sm:$0x1] }
 0x4c8   :  { %v357_v60 = vpop.permute.xlu1 %356 }
 0x4c9   :  { %v359_v61 = vadd.f32 %v357_v60, %v349_v59  ;;  %v534_v59 = vsel %vm2212_vm14, %v532_v57, %v533_v58 }
 0x4cb   :  { %1874 = vtanh.f32 %v359_v61 }
 0x4d8   :  { %v1875_v62 = vpop.eup %1874 }
 0x4d9   :  { %362 = vrot.lane.b32.xlu0 %v1875_v62, %s2103_s22 }
 0x54b   :  { %v363_v63 = vpop.permute.xlu0 %362 }
 0x54c   :  { %v2251_v0 = vmul.f32 %v363_v63, %v348_v56 }
 0x54e   :  { %v375_v1 = vpack.c.bf16 %v2251_v0, %v2251_v0 }
 0x550   :  { %377 = vrot.lane.b32.xlu1 %v375_v1, %s2109_s3 }
 0x5c2   :  { %v378_v2 = vpop.permute.xlu1 %377 }
 0x5c3   :  { %1740 = vmatmul.mubr.msk.bf16.vlgmr.msra.gmra.mxu1 %vm95_vm0, %v378_v2 }
 0x5c4   :  { %1752 = vmatpush3.bf16.msra.mxu1 %v2184_v5  ;;  %1755 = vmatprep.mubr.msk.bf16.mxu1 %vm2107_vm1, %v2106_v4 }
 0x5c5   :  { %1753 = vmatprep.subr.bf16.mxu1 %v2106_v4 }
 0x5c8   :  { %1754 = vmatpush3.bf16.msra.mxu1 %v2189_v7 }
 0x5c9   :  { %1767 = vmatprep.subr.bf16.mxu1 %v2106_v4 }
 0x683   :  { %v416_v9 = vpop.f32.mrf.mxu1 }
 0x684   :  { %v422_v10 = vadd.f32 %v416_v9, %v374_v8 }
 0x685   :  { %v1741_v11 = vpop.f32.mrf.mxu1 }
 0x686   :  { %v423_v12 = vmul.f32 0.5, %v422_v10 }
 0x687   :  { %v419_v13 = vpop.f32.mrf.mxu1 }
 0x688   :  { %v424_v14 = vsel %vm2219_vm2, %v422_v10, %v423_v12 }
 0x689   :  { %1876 = vtanh.f32 %v424_v14  ;;  %v1742_v15 = vpop.f32.mrf.mxu1 }
 0x696   :  { %v1877_v16 = vpop.eup %1876 }
 0x697   :  { %v426_v17 = vmul.f32 0.5, %v1877_v16 }
 0x699   :  { %v427_v18 = vadd.f32 0.5, %v426_v17 }
 0x69b   :  { %v428_v19 = vsel %vm2219_vm2, %v1877_v16, %v427_v18 }
 0x69c   :  { %431 = vrot.lane.b32.xlu0 %v428_v19, %s2103_s22  ;;  %v429_v23 = vmul.f32 %v428_v19, %v359_v61 }
 0x70e   :  { %v432_v20 = vpop.permute.xlu0 %431 }
 0x70f   :  { %v434_v22 = vmul.f32 %v432_v20, %v428_v19 }
 0x711   :  { %436 = vrot.lane.b32.xlu1 %v434_v22, %s2109_s3  ;;  %v612_v22 = vld [vmem:[#allocation2 + $0x5] sm:$0x1] }
 0x783   :  { %v437_v24 = vpop.permute.xlu1 %436 }
 0x784   :  { %v439_v25 = vadd.f32 %v437_v24, %v429_v23  ;;  %v613_v23 = vld [vmem:[#allocation2 + $0xa] sm:$0x1] }
 0x785   :  { %v614_v24 = vsel %vm2212_vm14, %v612_v22, %v613_v23 }
 0x786   :  { %1878 = vtanh.f32 %v439_v25 }
 0x793   :  { %v1879_v27 = vpop.eup %1878 }
 0x794   :  { %442 = vrot.lane.b32.xlu0 %v1879_v27, %s2103_s22 }
 0x806   :  { %v443_v28 = vpop.permute.xlu0 %442 }
 0x807   :  { %v2272_v29 = vmul.f32 %v443_v28, %v428_v19 }
 0x809   :  { %v455_v30 = vpack.c.bf16 %v2272_v29, %v2272_v29 }
 0x80b   :  { %457 = vrot.lane.b32.xlu1 %v455_v30, %s2109_s3 }
 0x87d   :  { %v458_v31 = vpop.permute.xlu1 %457 }
 0x87e   :  { %1748 = vmatmul.mubr.msk.bf16.vlgmr.msra.gmra.mxu0 %vm95_vm0, %v458_v31 }
 0x87f   :  { %1760 = vmatpush3.bf16.msra.mxu0 %v2184_v5  ;;  %1763 = vmatprep.mubr.msk.bf16.mxu0 %vm2107_vm1, %v2106_v4 }
 0x880   :  { %1761 = vmatprep.subr.bf16.mxu0 %v2106_v4 }
 0x883   :  { %1762 = vmatpush3.bf16.msra.mxu0 %v2189_v7 }
 0x884   :  { %1775 = vmatprep.subr.bf16.mxu0 %v2106_v4 }
 0x93e   :  { %v496_v35 = vpop.f32.mrf.mxu0 }
 0x93f   :  { %v502_v36 = vadd.f32 %v496_v35, %v454_v34 }
 0x940   :  { %v1749_v37 = vpop.f32.mrf.mxu0 }
 0x941   :  { %v503_v38 = vmul.f32 0.5, %v502_v36 }
 0x942   :  { %v499_v39 = vpop.f32.mrf.mxu0 }
 0x943   :  { %v504_v41 = vsel %vm2219_vm2, %v502_v36, %v503_v38 }
 0x944   :  { %1880 = vtanh.f32 %v504_v41  ;;  %v1750_v42 = vpop.f32.mrf.mxu0 }
 0x951   :  { %v1881_v43 = vpop.eup %1880 }
 0x952   :  { %v506_v44 = vmul.f32 0.5, %v1881_v43 }
 0x954   :  { %v507_v45 = vadd.f32 0.5, %v506_v44 }
 0x956   :  { %v508_v46 = vsel %vm2219_vm2, %v1881_v43, %v507_v45 }
 0x957   :  { %511 = vrot.lane.b32.xlu0 %v508_v46, %s2103_s22  ;;  %v509_v49 = vmul.f32 %v508_v46, %v439_v25 }
 0x9c9   :  { %v512_v47 = vpop.permute.xlu0 %511 }
 0x9ca   :  { %v514_v48 = vmul.f32 %v512_v47, %v508_v46 }
 0x9cc   :  { %516 = vrot.lane.b32.xlu1 %v514_v48, %s2109_s3 }
 0xa3e   :  { %v517_v50 = vpop.permute.xlu1 %516 }
 0xa3f   :  { %v519_v51 = vadd.f32 %v517_v50, %v509_v49  ;;  %v692_v49 = vld [vmem:[#allocation2 + $0x6] sm:$0x1]  ;;  %v693_v50 = vld [vmem:[#allocation2 + $0x9] sm:$0x1] }
 0xa41   :  { %1882 = vtanh.f32 %v519_v51 }
 0xa4e   :  { %v1883_v52 = vpop.eup %1882 }
 0xa4f   :  { %522 = vrot.lane.b32.xlu0 %v1883_v52, %s2103_s22 }
 0xac1   :  { %v523_v53 = vpop.permute.xlu0 %522 }
 0xac2   :  { %v2293_v54 = vmul.f32 %v523_v53, %v508_v46 }
 0xac4   :  { %v535_v55 = vpack.c.bf16 %v2293_v54, %v2293_v54 }
 0xac6   :  { %537 = vrot.lane.b32.xlu1 %v535_v55, %s2109_s3 }
 0xb38   :  { %v538_v56 = vpop.permute.xlu1 %537 }
 0xb39   :  { %1756 = vmatmul.mubr.msk.bf16.vlgmr.msra.gmra.mxu1 %vm95_vm0, %v538_v56 }
 0xb3a   :  { %1768 = vmatpush3.bf16.msra.mxu1 %v2184_v5  ;;  %1771 = vmatprep.mubr.msk.bf16.mxu1 %vm2107_vm1, %v2106_v4 }
 0xb3b   :  { %1769 = vmatprep.subr.bf16.mxu1 %v2106_v4 }
 0xb3e   :  { %1770 = vmatpush3.bf16.msra.mxu1 %v2189_v7 }
 0xb3f   :  { %1783 = vmatprep.subr.bf16.mxu1 %v2106_v4 }
 0xbf9   :  { %v576_v60 = vpop.f32.mrf.mxu1 }
 0xbfa   :  { %v582_v61 = vadd.f32 %v576_v60, %v534_v59 }
 0xbfb   :  { %v1757_v62 = vpop.f32.mrf.mxu1 }
 0xbfc   :  { %v583_v63 = vmul.f32 0.5, %v582_v61 }
 0xbfd   :  { %v579_v1 = vpop.f32.mrf.mxu1 }
 0xbfe   :  { %v584_v2 = vsel %vm2219_vm2, %v582_v61, %v583_v63 }
 0xbff   :  { %1884 = vtanh.f32 %v584_v2  ;;  %v1758_v3 = vpop.f32.mrf.mxu1 }
 0xc0c   :  { %v1885_v6 = vpop.eup %1884 }
 0xc0d   :  { %v586_v8 = vmul.f32 0.5, %v1885_v6 }
 0xc0f   :  { %v587_v9 = vadd.f32 0.5, %v586_v8 }
 0xc11   :  { %v588_v10 = vsel %vm2219_vm2, %v1885_v6, %v587_v9 }
 0xc12   :  { %591 = vrot.lane.b32.xlu0 %v588_v10, %s2103_s22  ;;  %v589_v13 = vmul.f32 %v588_v10, %v519_v51  ;;  %v694_v51 = vsel %vm2212_vm14, %v692_v49, %v693_v50 }
 0xc84   :  { %v592_v11 = vpop.permute.xlu0 %591 }
 0xc85   :  { %v594_v12 = vmul.f32 %v592_v11, %v588_v10 }
 0xc87   :  { %596 = vrot.lane.b32.xlu1 %v594_v12, %s2109_s3 }
 0xcf9   :  { %v597_v14 = vpop.permute.xlu1 %596 }
 0xcfa   :  { %v599_v15 = vadd.f32 %v597_v14, %v589_v13  ;;  %v772_v14 = vld [vmem:[#allocation2 + $0x7] sm:$0x1] }
 0xcfc   :  { %1886 = vtanh.f32 %v599_v15 }
 0xd09   :  { %v1887_v16 = vpop.eup %1886 }
 0xd0a   :  { %602 = vrot.lane.b32.xlu0 %v1887_v16, %s2103_s22 }
 0xd7c   :  { %v603_v17 = vpop.permute.xlu0 %602 }
 0xd7d   :  { %v2314_v18 = vmul.f32 %v603_v17, %v588_v10 }
 0xd7f   :  { %v615_v19 = vpack.c.bf16 %v2314_v18, %v2314_v18 }
 0xd81   :  { %617 = vrot.lane.b32.xlu1 %v615_v19, %s2109_s3 }
 0xdf3   :  { %v618_v20 = vpop.permute.xlu1 %617 }
 0xdf4   :  { %1764 = vmatmul.mubr.msk.bf16.vlgmr.msra.gmra.mxu0 %vm95_vm0, %v618_v20 }
 0xdf5   :  { %1776 = vmatpush3.bf16.msra.mxu0 %v2184_v5  ;;  %1779 = vmatprep.mubr.msk.bf16.mxu0 %vm2107_vm1, %v2106_v4 }
 0xdf6   :  { %1777 = vmatprep.subr.bf16.mxu0 %v2106_v4 }
 0xdf9   :  { %1778 = vmatpush3.bf16.msra.mxu0 %v2189_v7 }
 0xdfa   :  { %1791 = vmatprep.subr.bf16.mxu0 %v2106_v4 }
 0xeb4   :  { %v656_v25 = vpop.f32.mrf.mxu0 }
 0xeb5   :  { %v662_v27 = vadd.f32 %v656_v25, %v614_v24 }
 0xeb6   :  { %v1765_v28 = vpop.f32.mrf.mxu0 }
 0xeb7   :  { %v663_v30 = vmul.f32 0.5, %v662_v27 }
 0xeb8   :  { %v659_v31 = vpop.f32.mrf.mxu0 }
 0xeb9   :  { %v664_v32 = vsel %vm2219_vm2, %v662_v27, %v663_v30 }
 0xeba   :  { %1888 = vtanh.f32 %v664_v32  ;;  %v1766_v33 = vpop.f32.mrf.mxu0 }
 0xec7   :  { %v1889_v34 = vpop.eup %1888 }
 0xec8   :  { %v666_v35 = vmul.f32 0.5, %v1889_v34 }
 0xeca   :  { %v667_v36 = vadd.f32 0.5, %v666_v35 }
 0xecc   :  { %v668_v37 = vsel %vm2219_vm2, %v1889_v34, %v667_v36 }
 0xecd   :  { %671 = vrot.lane.b32.xlu0 %v668_v37, %s2103_s22  ;;  %v669_v41 = vmul.f32 %v668_v37, %v599_v15  ;;  %v773_v15 = vld [vmem:[#allocation2 + $0x8] sm:$0x1] }
 0xece   :  { %v774_v16 = vsel %vm2212_vm14, %v772_v14, %v773_v15 }
 0xf3f   :  { %v672_v38 = vpop.permute.xlu0 %671 }
 0xf40   :  { %v674_v39 = vmul.f32 %v672_v38, %v668_v37 }
 0xf42   :  { %676 = vrot.lane.b32.xlu1 %v674_v39, %s2109_s3 }
 0xfb4   :  { %v677_v42 = vpop.permute.xlu1 %676 }
 0xfb5   :  { %v679_v43 = vadd.f32 %v677_v42, %v669_v41 }
 0xfb7   :  { %1890 = vtanh.f32 %v679_v43 }
 0xfc4   :  { %v1891_v44 = vpop.eup %1890 }
 0xfc5   :  { %682 = vrot.lane.b32.xlu0 %v1891_v44, %s2103_s22  ;;  %v852_v44 = vld [vmem:[#allocation2 + $0x8] sm:$0x1] }
0x1037   :  { %v683_v45 = vpop.permute.xlu0 %682 }
0x1038   :  { %v2335_v46 = vmul.f32 %v683_v45, %v668_v37 }
0x103a   :  { %v695_v47 = vpack.c.bf16 %v2335_v46, %v2335_v46 }
0x103c   :  { %697 = vrot.lane.b32.xlu1 %v695_v47, %s2109_s3 }
0x10ae   :  { %v698_v48 = vpop.permute.xlu1 %697 }
0x10af   :  { %1772 = vmatmul.mubr.msk.bf16.vlgmr.msra.gmra.mxu1 %vm95_vm0, %v698_v48 }
0x10b0   :  { %1784 = vmatpush3.bf16.msra.mxu1 %v2184_v5  ;;  %1787 = vmatprep.mubr.msk.bf16.mxu1 %vm2107_vm1, %v2106_v4 }
0x10b1   :  { %1785 = vmatprep.subr.bf16.mxu1 %v2106_v4 }
0x10b4   :  { %1786 = vmatpush3.bf16.msra.mxu1 %v2189_v7 }
0x10b5   :  { %1799 = vmatprep.subr.bf16.mxu1 %v2106_v4 }
0x116f   :  { %v736_v52 = vpop.f32.mrf.mxu1 }
0x1170   :  { %v742_v53 = vadd.f32 %v736_v52, %v694_v51 }
0x1171   :  { %v1773_v55 = vpop.f32.mrf.mxu1 }
0x1172   :  { %v743_v56 = vmul.f32 0.5, %v742_v53 }
0x1173   :  { %v739_v57 = vpop.f32.mrf.mxu1 }
0x1174   :  { %v744_v58 = vsel %vm2219_vm2, %v742_v53, %v743_v56 }
0x1175   :  { %1892 = vtanh.f32 %v744_v58  ;;  %v1774_v59 = vpop.f32.mrf.mxu1 }
0x1182   :  { %v1893_v60 = vpop.eup %1892 }
0x1183   :  { %v746_v61 = vmul.f32 0.5, %v1893_v60 }
0x1185   :  { %v747_v62 = vadd.f32 0.5, %v746_v61 }
0x1187   :  { %v748_v63 = vsel %vm2219_vm2, %v1893_v60, %v747_v62 }
0x1188   :  { %751 = vrot.lane.b32.xlu0 %v748_v63, %s2103_s22  ;;  %v749_v3 = vmul.f32 %v748_v63, %v679_v43  ;;  %v853_v43 = vld [vmem:[#allocation2 + $0x7] sm:$0x1] }
0x1189   :  { %v854_v45 = vsel %vm2212_vm14, %v852_v44, %v853_v43 }
0x11fa   :  { %v752_v1 = vpop.permute.xlu0 %751 }
0x11fb   :  { %v754_v2 = vmul.f32 %v752_v1, %v748_v63 }
0x11fd   :  { %756 = vrot.lane.b32.xlu1 %v754_v2, %s2109_s3 }
0x126f   :  { %v757_v6 = vpop.permute.xlu1 %756 }
0x1270   :  { %v759_v8 = vadd.f32 %v757_v6, %v749_v3 }
0x1272   :  { %1894 = vtanh.f32 %v759_v8 }
0x127f   :  { %v1895_v9 = vpop.eup %1894 }
0x1280   :  { %762 = vrot.lane.b32.xlu0 %v1895_v9, %s2103_s22  ;;  %v933_v9 = vld [vmem:[#allocation2 + $0x6] sm:$0x1] }
0x12f2   :  { %v763_v10 = vpop.permute.xlu0 %762 }
0x12f3   :  { %v2356_v11 = vmul.f32 %v763_v10, %v748_v63  ;;  %v932_v10 = vld [vmem:[#allocation2 + $0x9] sm:$0x1] }
0x12f5   :  { %v775_v12 = vpack.c.bf16 %v2356_v11, %v2356_v11 }
0x12f7   :  { %777 = vrot.lane.b32.xlu1 %v775_v12, %s2109_s3  ;;  %v934_v12 = vsel %vm2212_vm14, %v932_v10, %v933_v9 }
0x1369   :  { %v778_v13 = vpop.permute.xlu1 %777 }
0x136a   :  { %1780 = vmatmul.mubr.msk.bf16.vlgmr.msra.gmra.mxu0 %vm95_vm0, %v778_v13 }
0x136b   :  { %1792 = vmatpush3.bf16.msra.mxu0 %v2184_v5  ;;  %1795 = vmatprep.mubr.msk.bf16.mxu0 %vm2107_vm1, %v2106_v4 }
0x136c   :  { %1793 = vmatprep.subr.bf16.mxu0 %v2106_v4 }
0x136f   :  { %1794 = vmatpush3.bf16.msra.mxu0 %v2189_v7 }
0x1370   :  { %1807 = vmatprep.subr.bf16.mxu0 %v2106_v4 }
0x142a   :  { %v816_v17 = vpop.f32.mrf.mxu0 }
0x142b   :  { %v822_v19 = vadd.f32 %v816_v17, %v774_v16 }
0x142c   :  { %v1781_v20 = vpop.f32.mrf.mxu0 }
0x142d   :  { %v823_v22 = vmul.f32 0.5, %v822_v19 }
0x142e   :  { %v819_v23 = vpop.f32.mrf.mxu0 }
0x142f   :  { %v824_v24 = vsel %vm2219_vm2, %v822_v19, %v823_v22 }
0x1430   :  { %1896 = vtanh.f32 %v824_v24  ;;  %v1782_v25 = vpop.f32.mrf.mxu0 }
0x143d   :  { %v1897_v27 = vpop.eup %1896 }
0x143e   :  { %v826_v28 = vmul.f32 0.5, %v1897_v27 }
0x1440   :  { %v827_v30 = vadd.f32 0.5, %v826_v28 }
0x1442   :  { %v828_v31 = vsel %vm2219_vm2, %v1897_v27, %v827_v30 }
0x1443   :  { %831 = vrot.lane.b32.xlu0 %v828_v31, %s2103_s22  ;;  %v829_v34 = vmul.f32 %v828_v31, %v759_v8 }
0x14b5   :  { %v832_v32 = vpop.permute.xlu0 %831 }
0x14b6   :  { %v834_v33 = vmul.f32 %v832_v32, %v828_v31 }
0x14b8   :  { %836 = vrot.lane.b32.xlu1 %v834_v33, %s2109_s3 }
0x152a   :  { %v837_v35 = vpop.permute.xlu1 %836 }
0x152b   :  { %v839_v36 = vadd.f32 %v837_v35, %v829_v34 }
0x152d   :  { %1898 = vtanh.f32 %v839_v36 }
0x153a   :  { %v1899_v37 = vpop.eup %1898 }
0x153b   :  { %842 = vrot.lane.b32.xlu0 %v1899_v37, %s2103_s22 }
0x15ad   :  { %v843_v38 = vpop.permute.xlu0 %842 }
0x15ae   :  { %v2377_v39 = vmul.f32 %v843_v38, %v828_v31  ;;  %v1013_v38 = vld [vmem:[#allocation2 + $0x5] sm:$0x1] }
0x15b0   :  { %v855_v41 = vpack.c.bf16 %v2377_v39, %v2377_v39 }
0x15b2   :  { %857 = vrot.lane.b32.xlu1 %v855_v41, %s2109_s3  ;;  %v1012_v41 = vld [vmem:[#allocation2 + $0xa] sm:$0x1] }
0x1624   :  { %v858_v42 = vpop.permute.xlu1 %857 }
0x1625   :  { %1788 = vmatmul.mubr.msk.bf16.vlgmr.msra.gmra.mxu1 %vm95_vm0, %v858_v42  ;;  %v1014_v42 = vsel %vm2212_vm14, %v1012_v41, %v1013_v38  ;;  %v1172_v38 = vld [vmem:[#allocation2 + $0xc] sm:$0x1] }
0x1626   :  { %1800 = vmatpush3.bf16.msra.mxu1 %v2184_v5  ;;  %1803 = vmatprep.mubr.msk.bf16.mxu1 %vm2107_vm1, %v2106_v4 }
0x1627   :  { %1801 = vmatprep.subr.bf16.mxu1 %v2106_v4 }
0x162a   :  { %1802 = vmatpush3.bf16.msra.mxu1 %v2189_v7 }
0x162b   :  { %1815 = vmatprep.subr.bf16.mxu1 %v2106_v4 }
0x16e5   :  { %v896_v47 = vpop.f32.mrf.mxu1 }
0x16e6   :  { %v902_v48 = vadd.f32 %v896_v47, %v854_v45 }
0x16e7   :  { %v1789_v49 = vpop.f32.mrf.mxu1 }
0x16e8   :  { %v903_v50 = vmul.f32 0.5, %v902_v48 }
0x16e9   :  { %v899_v51 = vpop.f32.mrf.mxu1 }
0x16ea   :  { %v904_v52 = vsel %vm2219_vm2, %v902_v48, %v903_v50 }
0x16eb   :  { %1900 = vtanh.f32 %v904_v52  ;;  %v1790_v53 = vpop.f32.mrf.mxu1 }
0x16f8   :  { %v1901_v55 = vpop.eup %1900 }
0x16f9   :  { %v906_v56 = vmul.f32 0.5, %v1901_v55 }
0x16fb   :  { %v907_v57 = vadd.f32 0.5, %v906_v56 }
0x16fd   :  { %v908_v58 = vsel %vm2219_vm2, %v1901_v55, %v907_v57 }
0x16fe   :  { %911 = vrot.lane.b32.xlu0 %v908_v58, %s2103_s22  ;;  %v909_v61 = vmul.f32 %v908_v58, %v839_v36 }
0x1770   :  { %v912_v59 = vpop.permute.xlu0 %911 }
0x1771   :  { %v914_v60 = vmul.f32 %v912_v59, %v908_v58 }
0x1773   :  { %916 = vrot.lane.b32.xlu1 %v914_v60, %s2109_s3 }
0x17e5   :  { %v917_v62 = vpop.permute.xlu1 %916 }
0x17e6   :  { %v919_v63 = vadd.f32 %v917_v62, %v909_v61 }
0x17e8   :  { %1902 = vtanh.f32 %v919_v63 }
0x17f5   :  { %v1903_v1 = vpop.eup %1902 }
0x17f6   :  { %922 = vrot.lane.b32.xlu0 %v1903_v1, %s2103_s22 }
0x1868   :  { %v923_v2 = vpop.permute.xlu0 %922 }
0x1869   :  { %v2398_v3 = vmul.f32 %v923_v2, %v908_v58 }
0x186b   :  { %v935_v6 = vpack.c.bf16 %v2398_v3, %v2398_v3 }
0x186d   :  { %937 = vrot.lane.b32.xlu1 %v935_v6, %s2109_s3  ;;  %v1093_v6 = vld [vmem:[#allocation2 + $0x4] sm:$0x1] }
0x18df   :  { %v938_v8 = vpop.permute.xlu1 %937 }
0x18e0   :  { %1796 = vmatmul.mubr.msk.bf16.vlgmr.msra.gmra.mxu0 %vm95_vm0, %v938_v8  ;;  %v1092_v8 = vld [vmem:[#allocation2 + $0xb] sm:$0x1] }
0x18e1   :  { %1808 = vmatpush3.bf16.msra.mxu0 %v2184_v5  ;;  %1811 = vmatprep.mubr.msk.bf16.mxu0 %vm2107_vm1, %v2106_v4  ;;  %v1094_v9 = vsel %vm2212_vm14, %v1092_v8, %v1093_v6  ;;  %v1253_v6 = vld [vmem:[#allocation2 + $0x2] sm:$0x1]  ;;  %v1252_v8 = vld [vmem:[#allocation2 + $0xd] sm:$0x1] }
0x18e2   :  { %1809 = vmatprep.subr.bf16.mxu0 %v2106_v4 }
0x18e5   :  { %1810 = vmatpush3.bf16.msra.mxu0 %v2189_v7 }
0x18e6   :  { %1823 = vmatprep.subr.bf16.mxu0 %v2106_v4 }
0x19a0   :  { %v976_v13 = vpop.f32.mrf.mxu0 }
0x19a1   :  { %v982_v14 = vadd.f32 %v976_v13, %v934_v12 }
0x19a2   :  { %v1797_v15 = vpop.f32.mrf.mxu0 }
0x19a3   :  { %v983_v16 = vmul.f32 0.5, %v982_v14 }
0x19a4   :  { %v979_v17 = vpop.f32.mrf.mxu0 }
0x19a5   :  { %v984_v19 = vsel %vm2219_vm2, %v982_v14, %v983_v16 }
0x19a6   :  { %1904 = vtanh.f32 %v984_v19  ;;  %v1798_v20 = vpop.f32.mrf.mxu0 }
0x19b3   :  { %v1905_v22 = vpop.eup %1904 }
0x19b4   :  { %v986_v23 = vmul.f32 0.5, %v1905_v22 }
0x19b6   :  { %v987_v24 = vadd.f32 0.5, %v986_v23 }
0x19b8   :  { %v988_v25 = vsel %vm2219_vm2, %v1905_v22, %v987_v24 }
0x19b9   :  { %991 = vrot.lane.b32.xlu0 %v988_v25, %s2103_s22  ;;  %v989_v30 = vmul.f32 %v988_v25, %v919_v63 }
0x1a2b   :  { %v992_v27 = vpop.permute.xlu0 %991 }
0x1a2c   :  { %v994_v28 = vmul.f32 %v992_v27, %v988_v25 }
0x1a2e   :  { %996 = vrot.lane.b32.xlu1 %v994_v28, %s2109_s3 }
0x1aa0   :  { %v997_v31 = vpop.permute.xlu1 %996 }
0x1aa1   :  { %v999_v32 = vadd.f32 %v997_v31, %v989_v30 }
0x1aa3   :  { %1906 = vtanh.f32 %v999_v32 }
0x1ab0   :  { %v1907_v33 = vpop.eup %1906 }
0x1ab1   :  { %1002 = vrot.lane.b32.xlu0 %v1907_v33, %s2103_s22 }
0x1b23   :  { %v1003_v34 = vpop.permute.xlu0 %1002 }
0x1b24   :  { %v2419_v35 = vmul.f32 %v1003_v34, %v988_v25 }
0x1b26   :  { %v1015_v36 = vpack.c.bf16 %v2419_v35, %v2419_v35 }
0x1b28   :  { %1017 = vrot.lane.b32.xlu1 %v1015_v36, %s2109_s3 }
0x1b9a   :  { %v1018_v37 = vpop.permute.xlu1 %1017 }
0x1b9b   :  { %1804 = vmatmul.mubr.msk.bf16.vlgmr.msra.gmra.mxu1 %vm95_vm0, %v1018_v37  ;;  %v1173_v37 = vld [vmem:[#allocation2 + $0x3] sm:$0x1] }
0x1b9c   :  { %1816 = vmatpush3.bf16.msra.mxu1 %v2184_v5  ;;  %1819 = vmatprep.mubr.msk.bf16.mxu1 %vm2107_vm1, %v2106_v4  ;;  %v1174_v41 = vsel %vm2212_vm14, %v1172_v38, %v1173_v37  ;;  %v1333_v37 = vld [vmem:[#allocation2 + $0x1] sm:$0x1]  ;;  %v1332_v38 = vld [vmem:[#allocation2 + $0xe] sm:$0x1] }
0x1b9d   :  { %1817 = vmatprep.subr.bf16.mxu1 %v2106_v4 }
0x1ba0   :  { %1818 = vmatpush3.bf16.msra.mxu1 %v2189_v7 }
0x1ba1   :  { %1831 = vmatprep.subr.bf16.mxu1 %v2106_v4 }
0x1c5b   :  { %v1056_v43 = vpop.f32.mrf.mxu1 }
0x1c5c   :  { %v1062_v44 = vadd.f32 %v1056_v43, %v1014_v42 }
0x1c5d   :  { %v1805_v45 = vpop.f32.mrf.mxu1 }
0x1c5e   :  { %v1063_v47 = vmul.f32 0.5, %v1062_v44 }
0x1c5f   :  { %v1059_v48 = vpop.f32.mrf.mxu1 }
0x1c60   :  { %v1064_v49 = vsel %vm2219_vm2, %v1062_v44, %v1063_v47 }
0x1c61   :  { %1908 = vtanh.f32 %v1064_v49  ;;  %v1806_v50 = vpop.f32.mrf.mxu1 }
0x1c6e   :  { %v1909_v51 = vpop.eup %1908 }
0x1c6f   :  { %v1066_v52 = vmul.f32 0.5, %v1909_v51 }
0x1c71   :  { %v1067_v53 = vadd.f32 0.5, %v1066_v52 }
0x1c73   :  { %v1068_v55 = vsel %vm2219_vm2, %v1909_v51, %v1067_v53 }
0x1c74   :  { %1071 = vrot.lane.b32.xlu0 %v1068_v55, %s2103_s22  ;;  %v1069_v58 = vmul.f32 %v1068_v55, %v999_v32 }
0x1ce6   :  { %v1072_v56 = vpop.permute.xlu0 %1071 }
0x1ce7   :  { %v1074_v57 = vmul.f32 %v1072_v56, %v1068_v55 }
0x1ce9   :  { %1076 = vrot.lane.b32.xlu1 %v1074_v57, %s2109_s3 }
0x1d5b   :  { %v1077_v59 = vpop.permute.xlu1 %1076 }
0x1d5c   :  { %v1079_v60 = vadd.f32 %v1077_v59, %v1069_v58 }
0x1d5e   :  { %1910 = vtanh.f32 %v1079_v60 }
0x1d6b   :  { %v1911_v61 = vpop.eup %1910 }
0x1d6c   :  { %1082 = vrot.lane.b32.xlu0 %v1911_v61, %s2103_s22 }
0x1dde   :  { %v1083_v62 = vpop.permute.xlu0 %1082 }
0x1ddf   :  { %v2440_v63 = vmul.f32 %v1083_v62, %v1068_v55 }
0x1de1   :  { %v1095_v1 = vpack.c.bf16 %v2440_v63, %v2440_v63 }
0x1de3   :  { %1097 = vrot.lane.b32.xlu1 %v1095_v1, %s2109_s3  ;;  %v1932_v1 = vld [vmem:[#allocation9 + $0x8] sm:$0xff]  }
0x1e55   :  { %v1098_v2 = vpop.permute.xlu1 %1097 }
0x1e56   :  { %1812 = vmatmul.mubr.msk.bf16.vlgmr.msra.gmra.mxu0 %vm95_vm0, %v1098_v2  ;;  %v1933_v2 = vld [vmem:[#allocation9] sm:$0xff]  }
0x1e57   :  { %1824 = vmatpush3.bf16.msra.mxu0 %v2184_v5  ;;  %1827 = vmatprep.mubr.msk.bf16.mxu0 %vm2107_vm1, %v2106_v4 }
0x1e58   :  { %1825 = vmatprep.subr.bf16.mxu0 %v2106_v4 }
0x1e5b   :  { %1826 = vmatpush3.bf16.msra.mxu0 %v2189_v7 }
0x1e5c   :  { %1839 = vmatprep.subr.bf16.mxu0 %v2106_v4 }
0x1f16   :  { %v1136_v10 = vpop.f32.mrf.mxu0 }
0x1f17   :  { %v1142_v12 = vadd.f32 %v1136_v10, %v1094_v9  ;;  %v1254_v9 = vsel %vm2212_vm14, %v1252_v8, %v1253_v6  ;;  %v1412_v6 = vld [vmem:[#allocation2 + $0xf] sm:$0x1] }
0x1f18   :  { %v1813_v13 = vpop.f32.mrf.mxu0 }
0x1f19   :  { %v1143_v14 = vmul.f32 0.5, %v1142_v12 }
0x1f1a   :  { %v1139_v15 = vpop.f32.mrf.mxu0 }
0x1f1b   :  { %v1144_v16 = vsel %vm2219_vm2, %v1142_v12, %v1143_v14 }
0x1f1c   :  { %1912 = vtanh.f32 %v1144_v16  ;;  %v1814_v17 = vpop.f32.mrf.mxu0 }
0x1f29   :  { %v1913_v19 = vpop.eup %1912 }
0x1f2a   :  { %v1146_v20 = vmul.f32 0.5, %v1913_v19 }
0x1f2c   :  { %v1147_v22 = vadd.f32 0.5, %v1146_v20 }
0x1f2e   :  { %v1148_v23 = vsel %vm2219_vm2, %v1913_v19, %v1147_v22 }
0x1f2f   :  { %1151 = vrot.lane.b32.xlu0 %v1148_v23, %s2103_s22  ;;  %v1149_v27 = vmul.f32 %v1148_v23, %v1079_v60 }
0x1fa1   :  { %v1152_v24 = vpop.permute.xlu0 %1151 }
0x1fa2   :  { %v1154_v25 = vmul.f32 %v1152_v24, %v1148_v23 }
0x1fa4   :  { %1156 = vrot.lane.b32.xlu1 %v1154_v25, %s2109_s3 }
0x2016   :  { %v1157_v28 = vpop.permute.xlu1 %1156 }
0x2017   :  { %v1159_v30 = vadd.f32 %v1157_v28, %v1149_v27 }
0x2019   :  { %1914 = vtanh.f32 %v1159_v30 }
0x2026   :  { %v1915_v31 = vpop.eup %1914 }
0x2027   :  { %1162 = vrot.lane.b32.xlu0 %v1915_v31, %s2103_s22 }
0x2099   :  { %v1163_v32 = vpop.permute.xlu0 %1162 }
0x209a   :  { %v2461_v33 = vmul.f32 %v1163_v32, %v1148_v23 }
0x209c   :  { %v1175_v34 = vpack.c.bf16 %v2461_v33, %v2461_v33 }
0x209e   :  { %1177 = vrot.lane.b32.xlu1 %v1175_v34, %s2109_s3 }
0x2110   :  { %v1178_v36 = vpop.permute.xlu1 %1177 }
0x2111   :  { %1820 = vmatmul.mubr.msk.bf16.vlgmr.msra.gmra.mxu1 %vm95_vm0, %v1178_v36 }
0x2112   :  { %1832 = vmatpush3.bf16.msra.mxu1 %v2184_v5  ;;  %1835 = vmatprep.mubr.msk.bf16.mxu1 %vm2107_vm1, %v2106_v4 }
0x2113   :  { %1833 = vmatprep.subr.bf16.mxu1 %v2106_v4 }
0x2116   :  { %1834 = vmatpush3.bf16.msra.mxu1 %v2189_v7 }
0x21d1   :  { %v1216_v42 = vpop.f32.mrf.mxu1 }
0x21d2   :  { %v1222_v43 = vadd.f32 %v1216_v42, %v1174_v41  ;;  %v1334_v41 = vsel %vm2212_vm14, %v1332_v38, %v1333_v37 }
0x21d3   :  { %v1821_v44 = vpop.f32.mrf.mxu1 }
0x21d4   :  { %v1223_v45 = vmul.f32 0.5, %v1222_v43 }
0x21d5   :  { %v1219_v47 = vpop.f32.mrf.mxu1 }
0x21d6   :  { %v1224_v5 = vsel %vm2219_vm2, %v1222_v43, %v1223_v45 }
0x21d7   :  { %1916 = vtanh.f32 %v1224_v5  ;;  %v1822_v48 = vpop.f32.mrf.mxu1 }
0x21e4   :  { %v1917_v49 = vpop.eup %1916 }
0x21e5   :  { %v1226_v50 = vmul.f32 0.5, %v1917_v49 }
0x21e7   :  { %v1227_v51 = vadd.f32 0.5, %v1226_v50 }
0x21e9   :  { %v1228_v7 = vsel %vm2219_vm2, %v1917_v49, %v1227_v51 }
0x21ea   :  { %1231 = vrot.lane.b32.xlu0 %v1228_v7, %s2103_s22  ;;  %v1229_v55 = vmul.f32 %v1228_v7, %v1159_v30 }
0x225c   :  { %v1232_v52 = vpop.permute.xlu0 %1231 }
0x225d   :  { %v1234_v53 = vmul.f32 %v1232_v52, %v1228_v7 }
0x225f   :  { %1236 = vrot.lane.b32.xlu1 %v1234_v53, %s2109_s3 }
0x22d1   :  { %v1237_v56 = vpop.permute.xlu1 %1236 }
0x22d2   :  { %v1239_v57 = vadd.f32 %v1237_v56, %v1229_v55 }
0x22d4   :  { %1918 = vtanh.f32 %v1239_v57 }
0x22e1   :  { %v1919_v58 = vpop.eup %1918 }
0x22e2   :  { %1242 = vrot.lane.b32.xlu0 %v1919_v58, %s2103_s22 }
0x2354   :  { %v1243_v59 = vpop.permute.xlu0 %1242 }
0x2355   :  { %v2481_v60 = vmul.f32 %v1243_v59, %v1228_v7 }
0x2357   :  { %v1255_v61 = vpack.c.bf16 %v2481_v60, %v2481_v60 }
0x2359   :  { %1257 = vrot.lane.b32.xlu1 %v1255_v61, %s2109_s3 }
0x23cb   :  { %v1258_v62 = vpop.permute.xlu1 %1257 }
0x23cc   :  { %1828 = vmatmul.mubr.msk.bf16.vlgmr.msra.gmra.mxu0 %vm95_vm0, %v1258_v62 }
0x23cd   :  { %1840 = vmatpush3.bf16.msra.mxu0 %v1932_v1  ;;  %1843 = vmatprep.mubr.msk.bf16.mxu0 %vm2107_vm1, %v2106_v4  ;;  %vm290_vm1 = vcmask 254080  }
0x23ce   :  { %1841 = vmatprep.subr.bf16.mxu0 %v2106_v4 }
0x23d1   :  { %1842 = vmatpush3.bf16.msra.mxu0 %v1933_v2  ;;  %v1413_v2 = vld [vmem:[#allocation2] sm:$0x1] }
0x23d2   :  { %v1414_v8 = vsel %vm2212_vm14, %v1412_v6, %v1413_v2 }
0x248c   :  { %v1296_v10 = vpop.f32.mrf.mxu0 }
0x248d   :  { %v1302_v12 = vadd.f32 %v1296_v10, %v1254_v9 }
0x248e   :  { %v1829_v13 = vpop.f32.mrf.mxu0 }
0x248f   :  { %v1303_v14 = vmul.f32 0.5, %v1302_v12 }
0x2490   :  { %v1299_v15 = vpop.f32.mrf.mxu0 }
0x2491   :  { %v1304_v16 = vsel %vm2219_vm2, %v1302_v12, %v1303_v14 }
0x2492   :  { %1920 = vtanh.f32 %v1304_v16  ;;  %v1830_v17 = vpop.f32.mrf.mxu0 }
0x249f   :  { %v1921_v19 = vpop.eup %1920 }
0x24a0   :  { %v1306_v20 = vmul.f32 0.5, %v1921_v19 }
0x24a2   :  { %v1307_v4 = vadd.f32 0.5, %v1306_v20 }
0x24a4   :  { %v1308_v22 = vsel %vm2219_vm2, %v1921_v19, %v1307_v4 }
0x24a5   :  { %1311 = vrot.lane.b32.xlu0 %v1308_v22, %s2103_s22  ;;  %v1309_v25 = vmul.f32 %v1308_v22, %v1239_v57 }
0x2517   :  { %v1312_v23 = vpop.permute.xlu0 %1311 }
0x2518   :  { %v1314_v24 = vmul.f32 %v1312_v23, %v1308_v22 }
0x251a   :  { %1316 = vrot.lane.b32.xlu1 %v1314_v24, %s2109_s3 }
0x258c   :  { %v1317_v27 = vpop.permute.xlu1 %1316 }
0x258d   :  { %v1319_v28 = vadd.f32 %v1317_v27, %v1309_v25 }
0x258f   :  { %1922 = vtanh.f32 %v1319_v28 }
0x259c   :  { %v1923_v30 = vpop.eup %1922 }
0x259d   :  { %1322 = vrot.lane.b32.xlu0 %v1923_v30, %s2103_s22 }
0x260f   :  { %v1323_v31 = vpop.permute.xlu0 %1322 }
0x2610   :  { %v2499_v32 = vmul.f32 %v1323_v31, %v1308_v22 }
0x2612   :  { %v1335_v34 = vpack.c.bf16 %v2499_v32, %v2499_v32 }
0x2614   :  { %1337 = vrot.lane.b32.xlu1 %v1335_v34, %s2109_s3 }
0x2686   :  { %v1338_v36 = vpop.permute.xlu1 %1337 }
0x2687   :  { %1836 = vmatmul.mubr.msk.bf16.vlgmr.msra.gmra.mxu1 %vm95_vm0, %v1338_v36 }
0x2747   :  { %v1376_v42 = vpop.f32.mrf.mxu1 }
0x2748   :  { %v1382_v43 = vadd.f32 %v1376_v42, %v1334_v41 }
0x2749   :  { %v1837_v44 = vpop.f32.mrf.mxu1 }
0x274a   :  { %v1383_v45 = vmul.f32 0.5, %v1382_v43 }
0x274b   :  { %v1379_v47 = vpop.f32.mrf.mxu1 }
0x274c   :  { %v1384_v5 = vsel %vm2219_vm2, %v1382_v43, %v1383_v45 }
0x274d   :  { %1924 = vtanh.f32 %v1384_v5  ;;  %v1838_v48 = vpop.f32.mrf.mxu1 }
0x275a   :  { %v1925_v49 = vpop.eup %1924 }
0x275b   :  { %v1386_v50 = vmul.f32 0.5, %v1925_v49 }
0x275d   :  { %v1387_v51 = vadd.f32 0.5, %v1386_v50 }
0x275f   :  { %v1388_v7 = vsel %vm2219_vm2, %v1925_v49, %v1387_v51 }
0x2760   :  { %1391 = vrot.lane.b32.xlu0 %v1388_v7, %s2103_s22  ;;  %v1389_v55 = vmul.f32 %v1388_v7, %v1319_v28 }
0x27d2   :  { %v1392_v52 = vpop.permute.xlu0 %1391 }
0x27d3   :  { %v1394_v53 = vmul.f32 %v1392_v52, %v1388_v7 }
0x27d5   :  { %1396 = vrot.lane.b32.xlu1 %v1394_v53, %s2109_s3 }
0x2847   :  { %v1397_v56 = vpop.permute.xlu1 %1396 }
0x2848   :  { %v1399_v57 = vadd.f32 %v1397_v56, %v1389_v55 }
0x284a   :  { %1926 = vtanh.f32 %v1399_v57 }
0x2857   :  { %v1927_v58 = vpop.eup %1926 }
0x2858   :  { %1402 = vrot.lane.b32.xlu0 %v1927_v58, %s2103_s22 }
0x28ca   :  { %v1403_v59 = vpop.permute.xlu0 %1402 }
0x28cb   :  { %v1405_v61 = vmul.f32 %v1403_v59, %v1388_v7 }
0x28cd   :  { %v1415_v62 = vpack.c.bf16 %v1405_v61, %v1405_v61 }
0x28cf   :  { %1417 = vrot.lane.b32.xlu1 %v1415_v62, %s2109_s3 }
0x2941   :  { %v1418_v1 = vpop.permute.xlu1 %1417 }
0x2942   :  { %1844 = vmatmul.mubr.msk.bf16.vlgmr.msra.gmra.mxu0 %vm95_vm0, %v1418_v1  ;;  %vm288_vm0 = vcmask 122880  }
0x2a02   :  { %v1456_v9 = vpop.f32.mrf.mxu0 }
0x2a03   :  { %v1462_v10 = vadd.f32 %v1456_v9, %v1414_v8 }
0x2a04   :  { %v1845_v12 = vpop.f32.mrf.mxu0 }
0x2a05   :  { %v1463_v13 = vmul.f32 0.5, %v1462_v10 }
0x2a06   :  { %v1459_v14 = vpop.f32.mrf.mxu0 }
0x2a07   :  { %v1464_v15 = vsel %vm2219_vm2, %v1462_v10, %v1463_v13 }
0x2a08   :  { %1928 = vtanh.f32 %v1464_v15  ;;  %v1846_v16 = vpop.f32.mrf.mxu0 }
0x2a15   :  { %v1929_v17 = vpop.eup %1928 }
0x2a16   :  { %v1466_v19 = vmul.f32 0.5, %v1929_v17 }
0x2a18   :  { %v1467_v20 = vadd.f32 0.5, %v1466_v19 }
0x2a1a   :  { %v1468_v4 = vsel %vm2219_vm2, %v1929_v17, %v1467_v20 }
0x2a1b   :  { %1471 = vrot.lane.b32.xlu0 %v1468_v4, %s2103_s22  ;;  %v1469_v26 = vmul.f32 %v1468_v4, %v1399_v57 }
0x2a8d   :  { %v1472_v21 = vpop.permute.xlu0 %1471 }
0x2a8e   :  { %v1474_v22 = vmul.f32 %v1472_v21, %v1468_v4 }
0x2a90   :  { %1476 = vrot.lane.b32.xlu1 %v1474_v22, %s2109_s3 }
0x2a94   :  { %285 = vrot.lane.b32.xlu1 %v2230_v40, %s2109_s3 }
0x2a98   :  { %447 = vrot.lane.b32.xlu1 %v2272_v29, %s2109_s3 }
0x2a9c   :  { %607 = vrot.lane.b32.xlu1 %v2314_v18, %s2109_s3 }
0x2aa0   :  { %767 = vrot.lane.b32.xlu1 %v2356_v11, %s2109_s3 }
0x2aa4   :  { %927 = vrot.lane.b32.xlu1 %v2398_v3, %s2109_s3 }
0x2aa8   :  { %1087 = vrot.lane.b32.xlu1 %v2440_v63, %s2109_s3 }
0x2aac   :  { %1247 = vrot.lane.b32.xlu1 %v2481_v60, %s2109_s3 }
0x2ab0   :  { %1407 = vrot.lane.b32.xlu1 %v1405_v61, %s2109_s3 }
0x2b02   :  { %v1477_v40 = vpop.permute.xlu1 %1476 }
0x2b03   :  { %v1479_v29 = vadd.f32 %v1477_v40, %v1469_v26 }
0x2b05   :  { %1930 = vtanh.f32 %v1479_v29 }
0x2b06   :  { %v286_v18 = vpop.permute.xlu1 %285 }
0x2b07   :  { %289 = vst.msk [vmem:[#allocation11] sm:$0x1] %vm288_vm0, %v286_v18 }
0x2b08   :  { %291 = vst.msk [vmem:[#allocation11 + $0xf] sm:$0x1] %vm290_vm1, %v286_v18 }
0x2b0a   :  { %v448_v11 = vpop.permute.xlu1 %447 }
0x2b0b   :  { %450 = vst.msk [vmem:[#allocation11 + $0x2] sm:$0x1] %vm288_vm0, %v448_v11 }
0x2b0c   :  { %451 = vst.msk [vmem:[#allocation11 + $0xd] sm:$0x1] %vm290_vm1, %v448_v11 }
0x2b0e   :  { %v608_v3 = vpop.permute.xlu1 %607 }
0x2b0f   :  { %610 = vst.msk [vmem:[#allocation11 + $0x4] sm:$0x1] %vm288_vm0, %v608_v3 }
0x2b10   :  { %611 = vst.msk [vmem:[#allocation11 + $0xb] sm:$0x1] %vm290_vm1, %v608_v3 }
0x2b12   :  { %v1931_v63 = vpop.eup %1930  ;;  %v768_v60 = vpop.permute.xlu1 %767 }
0x2b13   :  { %770 = vst.msk [vmem:[#allocation11 + $0x6] sm:$0x1] %vm288_vm0, %v768_v60  ;;  %1482 = vrot.lane.b32.xlu0 %v1931_v63, %s2103_s22 }
0x2b14   :  { %771 = vst.msk [vmem:[#allocation11 + $0x9] sm:$0x1] %vm290_vm1, %v768_v60 }
0x2b16   :  { %v928_v23 = vpop.permute.xlu1 %927 }
0x2b17   :  { %367 = vrot.lane.b32.xlu0 %v2251_v0, %s2109_s3 }
0x2b1a   :  { %v1088_v0 = vpop.permute.xlu1 %1087 }
0x2b1b   :  { %527 = vrot.lane.b32.xlu0 %v2293_v54, %s2109_s3 }
0x2b1e   :  { %v1248_v24 = vpop.permute.xlu1 %1247 }
0x2b1f   :  { %687 = vrot.lane.b32.xlu0 %v2335_v46, %s2109_s3 }
0x2b23   :  { %847 = vrot.lane.b32.xlu0 %v2377_v39, %s2109_s3  ;;  %v1408_v39 = vpop.permute.xlu1 %1407 }
0x2b27   :  { %1007 = vrot.lane.b32.xlu0 %v2419_v35, %s2109_s3 }
0x2b2b   :  { %1167 = vrot.lane.b32.xlu0 %v2461_v33, %s2109_s3 }
0x2b2f   :  { %1327 = vrot.lane.b32.xlu0 %v2499_v32, %s2109_s3 }
0x2b85   :  { %v1483_v25 = vpop.permute.xlu0 %1482 }
0x2b86   :  { %v1485_v54 = vmul.f32 %v1483_v25, %v1468_v4 }
0x2b88   :  { %1493 = vrot.lane.b32.xlu1 %v1485_v54, %s2110_s27  ;;  %1487 = vrot.lane.b32.xlu0 %v1485_v54, %s2109_s3 }
0x2b89   :  { %v368_v46 = vpop.permute.xlu0 %367 }
0x2b8a   :  { %370 = vst.msk [vmem:[#allocation11 + $0x1] sm:$0x1] %vm288_vm0, %v368_v46 }
0x2b8b   :  { %371 = vst.msk [vmem:[#allocation11 + $0xe] sm:$0x1] %vm290_vm1, %v368_v46  ;;  %1411 = vst.msk [vmem:[#allocation11 + $0x1] sm:$0x1] %vm290_vm1, %v1408_v39 }
0x2b8c   :  { %1410 = vst.msk [vmem:[#allocation11 + $0xe] sm:$0x1] %vm288_vm0, %v1408_v39  ;;  %1502 = vrot.lane.b32.xlu1 %v1479_v29, %s2111_s28  ;;  %1498 = vrot.lane.b32.xlu0 %v1479_v29, %s2112_s29 }
0x2b8d   :  { %v528_v35 = vpop.permute.xlu0 %527 }
0x2b8e   :  { %530 = vst.msk [vmem:[#allocation11 + $0x3] sm:$0x1] %vm288_vm0, %v528_v35 }
0x2b8f   :  { %531 = vst.msk [vmem:[#allocation11 + $0xc] sm:$0x1] %vm290_vm1, %v528_v35  ;;  %1251 = vst.msk [vmem:[#allocation11 + $0x3] sm:$0x1] %vm290_vm1, %v1248_v24 }
0x2b90   :  { %1250 = vst.msk [vmem:[#allocation11 + $0xc] sm:$0x1] %vm288_vm0, %v1248_v24 }
0x2b91   :  { %v688_v33 = vpop.permute.xlu0 %687 }
0x2b92   :  { %690 = vst.msk [vmem:[#allocation11 + $0x5] sm:$0x1] %vm288_vm0, %v688_v33 }
0x2b93   :  { %691 = vst.msk [vmem:[#allocation11 + $0xa] sm:$0x1] %vm290_vm1, %v688_v33  ;;  %1091 = vst.msk [vmem:[#allocation11 + $0x5] sm:$0x1] %vm290_vm1, %v1088_v0 }
0x2b94   :  { %1090 = vst.msk [vmem:[#allocation11 + $0xa] sm:$0x1] %vm288_vm0, %v1088_v0 }
0x2b95   :  { %v848_v27 = vpop.permute.xlu0 %847 }
0x2b96   :  { %850 = vst.msk [vmem:[#allocation11 + $0x7] sm:$0x1] %vm288_vm0, %v848_v27 }
0x2b97   :  { %851 = vst.msk [vmem:[#allocation11 + $0x8] sm:$0x1] %vm290_vm1, %v848_v27  ;;  %931 = vst.msk [vmem:[#allocation11 + $0x7] sm:$0x1] %vm290_vm1, %v928_v23 }
0x2b98   :  { %930 = vst.msk [vmem:[#allocation11 + $0x8] sm:$0x1] %vm288_vm0, %v928_v23 }
0x2b99   :  { %v1008_v28 = vpop.permute.xlu0 %1007 }
0x2b9a   :  { %1010 = vst.msk [vmem:[#allocation11 + $0x9] sm:$0x1] %vm288_vm0, %v1008_v28 }
0x2b9b   :  { %1011 = vst.msk [vmem:[#allocation11 + $0x6] sm:$0x1] %vm290_vm1, %v1008_v28 }
0x2b9d   :  { %v1168_v30 = vpop.permute.xlu0 %1167 }
0x2b9e   :  { %1170 = vst.msk [vmem:[#allocation11 + $0xb] sm:$0x1] %vm288_vm0, %v1168_v30 }
0x2b9f   :  { %1171 = vst.msk [vmem:[#allocation11 + $0x4] sm:$0x1] %vm290_vm1, %v1168_v30 }
0x2ba1   :  { %v1328_v31 = vpop.permute.xlu0 %1327 }
0x2ba2   :  { %1330 = vst.msk [vmem:[#allocation11 + $0xd] sm:$0x1] %vm288_vm0, %v1328_v31 }
0x2ba3   :  { %1331 = vst.msk [vmem:[#allocation11 + $0x2] sm:$0x1] %vm290_vm1, %v1328_v31 }
0x2bfa   :  { %v1494_v32 = vpop.permute.xlu1 %1493  ;;  %v1488_v34 = vpop.permute.xlu0 %1487 }
0x2bfb   :  { %1496 = vst.msk [vmem:[#allocation14 + $0x1] sm:$0x1] %vm288_vm0, %v1494_v32  ;;  %1490 = vst.msk [vmem:[#allocation11 + $0xf] sm:$0x1] %vm288_vm0, %v1488_v34 }
0x2bfc   :  { %1491 = vst.msk [vmem:[#allocation11] sm:$0x1] %vm290_vm1, %v1488_v34 }
0x2bfd   :  { %1492 = vst.msk [vmem:[#allocation14] sm:$0x1] %vm288_vm0, %v1488_v34 }
0x2bfe   :  { %2017 = shalt.err (!%p2014_p4)
}
0x2bff   :  { %1550 = dma.vmem_to_hbm [thread:$0]  %s1545_s15, 256, %s2627_s5, [#allocation5], %s2100_s10, %s2100_s10, %s2101_s11   ;;  %v1503_v36 = vpop.permute.xlu1 %1502  ;;  %v1499_v37 = vpop.permute.xlu0 %1498  ;;  %vm1513_vm3 = vcmask 253952  }
0x2c00   :  { %s2115_s1 = smov [#allocation12]   ;;  %1505 = vst.msk [vmem:[#allocation15 + $0x1] sm:$0x1] %vm288_vm0, %v1503_v36  ;;  %1501 = vst.msk [vmem:[#allocation15] sm:$0x1] %vm288_vm0, %v1499_v37  ;;  %s2116_s22 = smov [#allocation14]  }
0x2c01   :  { %s1557_s21 = sshll.u32 %s2115_s1, 4  ;;  %s1567_s23 = sshll.u32 %s2116_s22, 4  ;;  %s1558_s21 = int_to_ptr.vmem [resolvable:$true] %s1557_s21  ;;  %s1568_s23 = int_to_ptr.vmem [resolvable:$true] %s1567_s23 }
0x2c02   :  { %s2026_s24 = scalar_lea.vmem %s1578_s17, 32  ;;  %p2031_p6 = scmp.lt.s32.totalorder %s1578_s17, %s1578_s17 }
0x2c03   :  { %p2027_p5 = scmp.ne.s32.totalorder %s1578_s17, %s2026_s24  ;;  %p2032_p7 = scmp.lt.s32.totalorder %s2026_s24, %s2026_s24 }
0x2c05   :  { %p2033_p8 = por %p2032_p7, %p2031_p6 }
0x2c07   :  { %p2034_p9 = pnand %p2033_p8, %p2027_p5 }
0x2c09   :  { %2037 = shalt.err (!%p2034_p9)
}
0x2c0a   :  { %1580 = dma.vmem_to_hbm [thread:$0]  %s1578_s17, 32, %s2630_s8, [#allocation16]  }
0x2c0b   :  { %s1511_s11 = scalar_lea.vmem [#allocation11], %s2640_s30  ;;  %s1520_s0 = scalar_lea.vmem [#allocation11], %s2644_s9 }
0x2c0c   :  { %v1512_v38 = vld [vmem:[%s1511_s11] sm:$0x1]  ;;  %s1528_s25 = scalar_lea.vmem [#allocation11], %s2648_s12  ;;  %s1536_s4 = scalar_lea.vmem [#allocation11], %s2650_s13 }
0x2c0d   :  { %v1521_v41 = vld [vmem:[%s1520_s0] sm:$0x1]  ;;  %1514 = vst.msk [vmem:[#allocation12] sm:$0x1] %vm1513_vm3, %v1512_v38  ;;  %s2046_s2 = scalar_lea.vmem %s1558_s21, 64  ;;  %p2051_p11 = scmp.lt.s32.totalorder %s1558_s21, %s1558_s21 }
0x2c0e   :  { %v1529_v42 = vld [vmem:[%s1528_s25] sm:$0x1]  ;;  %1522 = vst.msk [vmem:[#allocation12 + $0x1] sm:$0x1] %vm1513_vm3, %v1521_v41  ;;  %p2047_p10 = scmp.ne.s32.totalorder %s1558_s21, %s2046_s2  ;;  %p2052_p12 = scmp.lt.s32.totalorder %s2046_s2, %s2046_s2 }
0x2c0f   :  { %1530 = vst.msk [vmem:[#allocation12 + $0x2] sm:$0x1] %vm1513_vm3, %v1529_v42  ;;  %v1537_v43 = vld [vmem:[%s1536_s4] sm:$0x1] }
0x2c10   :  { %1538 = vst.msk [vmem:[#allocation12 + $0x3] sm:$0x1] %vm1513_vm3, %v1537_v43  ;;  %p2053_p13 = por %p2052_p12, %p2051_p11 }
0x2c12   :  { %p2054_p0 = pnand %p2053_p13, %p2047_p10 }
0x2c14   :  { %2057 = shalt.err (!%p2054_p0)
}
0x2c15   :  { %1560 = dma.vmem_to_hbm [thread:$0]  %s1558_s21, 64, %s2628_s6, [#allocation13]  }
0x2c16   :  { %s2066_s3 = scalar_lea.vmem %s1568_s23, 32  ;;  %p2071_p2 = scmp.lt.s32.totalorder %s1568_s23, %s1568_s23 }
0x2c17   :  { %p2067_p1 = scmp.ne.s32.totalorder %s1568_s23, %s2066_s3  ;;  %p2072_p3 = scmp.lt.s32.totalorder %s2066_s3, %s2066_s3 }
0x2c19   :  { %p2073_p4 = por %p2072_p3, %p2071_p2 }
0x2c1b   :  { %p2074_p5 = pnand %p2073_p4, %p2067_p1 }
0x2c1d   :  { %2077 = shalt.err (!%p2074_p5)
}
0x2c1e   :  { %1570 = dma.vmem_to_hbm [thread:$0]  %s1568_s23, 32, %s2629_s7, [#allocation13]  }
0x2c1f   :  { %2092 = dma.done.wait [#allocation5], 256  }
0x2c20   :  { %2093 = vsyncadd [#allocation5], 4294967040 }
0x2c21   :  { %2094 = dma.done.wait [#allocation13], 96  }
0x2c22   :  { %2095 = vsyncadd [#allocation13], 4294967200 }
0x2c23   :  { %2096 = dma.done.wait [#allocation16], 32  }
0x2c24   :  { %2097 = vsyncadd [#allocation16], 4294967264 }
0x2c25   :  { %1593 = vsyncpa [#allocation4], 1 }
0x2c26   :  { %1594 = vsyncpa [#allocation8], 1 }
0x2c27   :  { %1595 = vsyncpa [#allocation5], 1 }
0x2c28   :  { %1596 = vsyncpa [#allocation13], 1 }
0x2c29   :  { %1597 = vsyncpa [#allocation16], 1 }
0x2c2a   :  { %1598 = vsyncpa [#allocation6], 1 }

</bundles_post_ra>
